<compile_context>
chip_gen: v7x
topology: tpu7x:2x2x1
jax: 0.10.0
libtpu: 0.0.40
codegen_flags: <defaults>
</compile_context>

<pallas_src>
import jax
import jax.numpy as jnp
from jax.experimental import pallas as pl
from jax.experimental.pallas import tpu as pltpu


def _round_up(x, m):
    return (x + m - 1) // m * m


def _vmem_limit_bytes():
    # v7x has only 64 MiB VMEM/TC -> leave ~15% headroom for Mosaic internal
    # scratch; v5e/v6e (128 MiB) get up to 100 MiB to buy bigger tiles.
    try:
        cap = pltpu.get_tpu_info().vmem_capacity_bytes
    except Exception:
        cap = 64 * 1024 * 1024
    return int(min(100 * 1024 * 1024, int(cap * 0.85)))


# -----------------------------------------------------------------------------
# Stage 0 kernel: fused MLP + hop-0 gated contribution
# -----------------------------------------------------------------------------
def _dagnn_mlp_kernel(x_ref, w1_ref, b1_ref, w2_ref, b2_ref, s_ref,
                      x0_ref, acc_ref):
    hid = jnp.dot(x_ref[...], w1_ref[...], preferred_element_type=jnp.float32)
    hid = jnp.maximum(hid + b1_ref[...], 0.0)
    h0 = jnp.dot(hid, w2_ref[...], preferred_element_type=jnp.float32) + b2_ref[...]
    gate = jax.nn.sigmoid(jnp.sum(h0 * s_ref[...], axis=-1, keepdims=True))
    # NOTE: padded rows (>= n) of x_0 are nonzero (relu(b1)@W2 + b2); this is safe
    # because padded A columns are zero and padded rows are sliced off at the end.
    x0_ref[...] = h0.astype(jnp.bfloat16)     # hop state kept in bf16 (MXU operand dtype)
    acc_ref[...] = gate * h0                  # gated running sum stays f32


# -----------------------------------------------------------------------------
# Per-hop propagation kernel: x_h = A @ x_{h-1};  acc += sigmoid(x_h s) * x_h
# -----------------------------------------------------------------------------
def _dagnn_prop_kernel(a_ref, xprev_ref, accin_ref, s_ref,
                       xnew_ref, accout_ref, acc_tile):
    k = pl.program_id(1)
    nk = pl.num_programs(1)
    tk = a_ref.shape[1]
    col0 = pl.multiple_of(k * tk, tk)

    # bf16 x bf16 operands, f32 accumulation on the MXU (propagation is HBM-bound on A).
    prod = jnp.dot(a_ref[...], xprev_ref[pl.ds(col0, tk), :],
                   preferred_element_type=jnp.float32)

    @pl.when(k == 0)
    def _():
        acc_tile[...] = prod

    @pl.when(k > 0)
    def _():
        acc_tile[...] = acc_tile[...] + prod

    @pl.when(k == nk - 1)
    def _():
        xnew = acc_tile[...]                                   # f32 row tile of x_h
        xnew_ref[...] = xnew.astype(jnp.bfloat16)
        gate = jax.nn.sigmoid(jnp.sum(xnew * s_ref[...], axis=-1, keepdims=True))
        accout_ref[...] = accin_ref[...] + gate * xnew         # aliased in-place update


# -----------------------------------------------------------------------------
# Wrapper: padding, tiling, BlockSpecs
# -----------------------------------------------------------------------------
def pack_adjacency(a_norm, tile=1024):
    """One-time bf16 cast + zero-pad of the normalized adjacency.

    Hoisted out of dagnn_forward so static graphs do not pay a full N^2 XLA
    pass over A on every forward call.
    """
    n = a_norm.shape[0]
    n_pad = _round_up(n, tile)
    return jnp.zeros((n_pad, n_pad), jnp.bfloat16).at[:n, :n].set(
        a_norm.astype(jnp.bfloat16))


def dagnn_forward(x, a_packed, w1, b1, w2, b2, s, hop, *, tile_m=512, tile_k=1024):
    """DAGNN forward.

    x: (N, Fin) f32; a_packed: (N_pad, N_pad) bf16 from pack_adjacency;
    w1: (Fin, Fhid), w2: (Fhid, Fout)  (pre-transposed so y = x @ w + b);
    b1: (Fhid,), b2: (Fout,), s: (Fout,); hop: static python int.
    """
    n, f_in = x.shape
    f_hid = w1.shape[1]
    f_out = w2.shape[1]
    n_pad = a_packed.shape[0]
    f_pad = _round_up(f_out, 128)            # lane-dense feature width

    tm = min(tile_m, n_pad)
    tk = min(tile_k, n_pad)
    assert n_pad % tm == 0 and n_pad % tk == 0, "pack_adjacency tile must match"

    # Zero padding keeps the math exact: padded A rows/cols are 0, padded W2/b2/s
    # lanes are 0 (so padded feature lanes never influence the gate).
    x_p = jnp.zeros((n_pad, f_in), jnp.float32).at[:n, :].set(x.astype(jnp.float32))
    w1_p = w1.astype(jnp.float32)
    b1_p = jnp.reshape(b1, (1, f_hid)).astype(jnp.float32)
    w2_p = jnp.zeros((f_hid, f_pad), jnp.float32).at[:, :f_out].set(w2.astype(jnp.float32))
    b2_p = jnp.zeros((1, f_pad), jnp.float32).at[0, :f_out].set(jnp.reshape(b2, (-1,)))
    s_p = jnp.zeros((1, f_pad), jnp.float32).at[0, :f_out].set(jnp.reshape(s, (-1,)))

    vmem_limit = _vmem_limit_bytes()
    const = lambda *_: (0, 0)

    # ---------------- stage 0: MLP + hop-0 gate ----------------
    x0, acc = pl.pallas_call(
        _dagnn_mlp_kernel,
        out_shape=(jax.ShapeDtypeStruct((n_pad, f_pad), jnp.bfloat16),
                   jax.ShapeDtypeStruct((n_pad, f_pad), jnp.float32)),
        grid_spec=pltpu.PrefetchScalarGridSpec(
            num_scalar_prefetch=0,
            grid=(n_pad // tm,),
            in_specs=[
                pl.BlockSpec((tm, f_in), lambda i: (i, 0)),
                pl.BlockSpec((f_in, f_hid), const),
                pl.BlockSpec((1, f_hid), const),
                pl.BlockSpec((f_hid, f_pad), const),
                pl.BlockSpec((1, f_pad), const),
                pl.BlockSpec((1, f_pad), const),
            ],
            out_specs=[pl.BlockSpec((tm, f_pad), lambda i: (i, 0)),
                       pl.BlockSpec((tm, f_pad), lambda i: (i, 0))],
        ),
        compiler_params=pltpu.CompilerParams(
            dimension_semantics=("parallel",),
            vmem_limit_bytes=vmem_limit,
        ),
        cost_estimate=pl.CostEstimate(
            flops=int(2 * n_pad * (f_in * f_hid + f_hid * f_pad)),
            transcendentals=int(n_pad),
            bytes_accessed=int(n_pad * (f_in + f_pad + 2 * f_pad) * 4),
        ),
    )(x_p, w1_p, b1_p, w2_p, b2_p, s_p)

    # ---------------- stages 1..hop: propagation ----------------
    prop = pl.pallas_call(
        _dagnn_prop_kernel,
        out_shape=(jax.ShapeDtypeStruct((n_pad, f_pad), jnp.bfloat16),    # x_h
                   jax.ShapeDtypeStruct((n_pad, f_pad), jnp.float32)),    # gated running sum
        grid_spec=pltpu.PrefetchScalarGridSpec(
            num_scalar_prefetch=0,
            grid=(n_pad // tm, n_pad // tk),
            in_specs=[
                pl.BlockSpec((tm, tk), lambda i, k: (i, k)),          # A tile (streamed, bf16)
                pl.BlockSpec((n_pad, f_pad), lambda i, k: (0, 0)),    # x_{h-1}: VMEM-resident
                pl.BlockSpec((tm, f_pad), lambda i, k: (i, 0)),       # acc in  (aliased)
                pl.BlockSpec((1, f_pad), lambda i, k: (0, 0)),        # s
            ],
            out_specs=[pl.BlockSpec((tm, f_pad), lambda i, k: (i, 0)),
                       pl.BlockSpec((tm, f_pad), lambda i, k: (i, 0))],
            scratch_shapes=[pltpu.VMEM((tm, f_pad), jnp.float32)],    # per-row-tile f32 acc
        ),
        input_output_aliases={2: 1},   # acc is updated in place (no extra HBM buffer)
        compiler_params=pltpu.CompilerParams(
            # Row axis parallel: no cross-row-tile VMEM state -> shards across
            # both v7x TensorCores; k is the contraction axis.
            dimension_semantics=("parallel", "arbitrary"),
            vmem_limit_bytes=vmem_limit,
        ),
        cost_estimate=pl.CostEstimate(
            flops=int(2 * n_pad * n_pad * f_pad),
            transcendentals=int(n_pad),
            bytes_accessed=int(n_pad * n_pad * 2 + n_pad * f_pad * (2 + 2 + 4 + 4)),
        ),
    )

    xk = x0
    for _ in range(hop):
        xk, acc = prop(a_packed, xk, acc, s_p)

    return acc[:n, :f_out]


# -----------------------------------------------------------------------------
# Glue: normalized adjacency + deterministic parameter init (plain JAX)
# -----------------------------------------------------------------------------
def norm_adj(a, add_self_loops=True):
    """Symmetric normalization D^-1/2 (A + I) D^-1/2 (dense)."""
    if add_self_loops:
        a = a + jnp.eye(a.shape[0], dtype=a.dtype)
    deg = jnp.sum(a, axis=1)
    d_inv_sqrt = jnp.where(deg > 0, 1.0 / jnp.sqrt(deg), 0.0)
    return a * d_inv_sqrt[:, None] * d_inv_sqrt[None, :]


def xavier_uniform(key, shape, gain):
    fan_out, fan_in = shape
    bound = gain * (6.0 / (fan_in + fan_out)) ** 0.5
    return jax.random.uniform(key, shape, jnp.float32, -bound, bound)


def init_dagnn_params(key, n_in, n_hid, n_out):
    k1, k2, k3, k4, k5 = jax.random.split(key, 5)
    gain_relu = 2.0 ** 0.5
    gain_sigmoid = 1.0
    w1 = xavier_uniform(k1, (n_hid, n_in), gain_relu)        # linear1.weight
    w2 = xavier_uniform(k2, (n_out, n_hid), 1.0)             # linear2.weight
    s = xavier_uniform(k3, (n_out, 1), gain_sigmoid)         # attention vector
    b1 = jax.random.uniform(k4, (n_hid,), jnp.float32,
                            -1.0 / n_in ** 0.5, 1.0 / n_in ** 0.5)
    b2 = jax.random.uniform(k5, (n_out,), jnp.float32,
                            -1.0 / n_hid ** 0.5, 1.0 / n_hid ** 0.5)
    return w1, b1, w2, b2, s


if __name__ == "__main__":
    key = jax.random.PRNGKey(0)
    N, F_IN, F_HID, F_OUT, HOP = 64, 16, 32, 16, 3

    k_x, k_a, k_p = jax.random.split(key, 3)
    x = jax.random.normal(k_x, (N, F_IN), jnp.float32)

    # deterministic synthetic (symmetric, binary) adjacency
    a_rand = jax.random.uniform(k_a, (N, N), jnp.float32)
    a = (a_rand + a_rand.T > 1.4).astype(jnp.float32)
    a = a * (1.0 - jnp.eye(N, dtype=jnp.float32))
    a_norm = norm_adj(a, True)

    w1, b1, w2, b2, s = init_dagnn_params(k_p, F_IN, F_HID, F_OUT)
    w1_t = w1.T                      # (F_IN, F_HID)
    w2_t = w2.T                      # (F_HID, F_OUT)

    # one-time A packing (bf16 cast + pad) hoisted out of the forward path
    a_packed = pack_adjacency(a_norm)

    out = dagnn_forward(x, a_packed, w1_t, b1, w2_t, b2, s.reshape(-1), HOP)
    out = jax.block_until_ready(out)

    # reference in plain f32 JAX (kernel uses bf16 A / bf16 hop state in propagation,
    # so compare with a looser tolerance)
    h_ref = jnp.maximum(x @ w1_t + b1[None, :], 0.0) @ w2_t + b2[None, :]
    outs = [h_ref]
    xk = h_ref
    for _ in range(HOP):
        xk = a_norm @ xk
        outs.append(xk)
    H = jnp.stack(outs, axis=1)                            # (N, HOP+1, F_OUT)
    S = jax.nn.sigmoid(H @ s)                              # (N, HOP+1, 1)
    ref = jnp.squeeze(jnp.swapaxes(S, 1, 2) @ H)           # (N, F_OUT)

    assert out.shape == (N, F_OUT)
    assert jnp.allclose(out, ref, atol=5e-2, rtol=5e-2), "mismatch vs reference"

    print("KERNEL_OK")
</pallas_src>

<mosaic_0001>
module attributes {stable_mosaic.version = 11 : i64} {
  func.func @_dagnn_mlp_kernel(%arg0: i32, %arg1: memref<512x16xf32, #tpu.memory_space<vmem>>, %arg2: memref<16x32xf32, #tpu.memory_space<vmem>>, %arg3: memref<1x32xf32, #tpu.memory_space<vmem>>, %arg4: memref<32x128xf32, #tpu.memory_space<vmem>>, %arg5: memref<1x128xf32, #tpu.memory_space<vmem>>, %arg6: memref<1x128xf32, #tpu.memory_space<vmem>>, %arg7: memref<512x128xbf16, #tpu.memory_space<vmem>>, %arg8: memref<512x128xf32, #tpu.memory_space<vmem>>) attributes {dimension_semantics = [#tpu.dimension_semantics<parallel>], iteration_bounds = array<i64: 2>, scalar_prefetch = 0 : i64, scratch_operands = 0 : i64, tpu.core_type = #tpu.core_type<tc>, window_params = [{transform_indices = @transform_0, window_bounds = array<i64: 512, 16>}, {pipeline_mode = #tpu.pipeline_mode<synchronous>, transform_indices = @transform_1, window_bounds = array<i64: 16, 32>}, {pipeline_mode = #tpu.pipeline_mode<synchronous>, transform_indices = @transform_2, window_bounds = array<i64: 1, 32>}, {pipeline_mode = #tpu.pipeline_mode<synchronous>, transform_indices = @transform_3, window_bounds = array<i64: 32, 128>}, {pipeline_mode = #tpu.pipeline_mode<synchronous>, transform_indices = @transform_4, window_bounds = array<i64: 1, 128>}, {pipeline_mode = #tpu.pipeline_mode<synchronous>, transform_indices = @transform_5, window_bounds = array<i64: 1, 128>}, {transform_indices = @transform_6, window_bounds = array<i64: 512, 128>}, {transform_indices = @transform_7, window_bounds = array<i64: 512, 128>}]} {
    %c0 = arith.constant 0 : index
    %c0_0 = arith.constant 0 : index
    %0 = vector.load %arg1[%c0, %c0_0] : memref<512x16xf32, #tpu.memory_space<vmem>>, vector<512x16xf32>
    %c0_1 = arith.constant 0 : index
    %c0_2 = arith.constant 0 : index
    %1 = vector.load %arg2[%c0_1, %c0_2] : memref<16x32xf32, #tpu.memory_space<vmem>>, vector<16x32xf32>
    %cst = arith.constant dense<0.000000e+00> : vector<512x32xf32>
    %2 = tpu.matmul %0, %1, %cst {dimension_numbers = #tpu.dot_dimension_numbers<[1], [0], [0], [1], [0, 0, 1, 1], [], []>} : vector<512x16xf32>, vector<16x32xf32>, vector<512x32xf32> -> vector<512x32xf32>
    %c0_3 = arith.constant 0 : index
    %c0_4 = arith.constant 0 : index
    %3 = vector.load %arg3[%c0_3, %c0_4] : memref<1x32xf32, #tpu.memory_space<vmem>>, vector<1x32xf32>
    %4 = vector.broadcast %3 : vector<1x32xf32> to vector<512x32xf32>
    %5 = arith.addf %2, %4 : vector<512x32xf32>
    %cst_5 = arith.constant 0.000000e+00 : f32
    %6 = vector.broadcast %cst_5 : f32 to vector<512x32xf32>
    %7 = arith.maximumf %5, %6 : vector<512x32xf32>
    %c0_6 = arith.constant 0 : index
    %c0_7 = arith.constant 0 : index
    %8 = vector.load %arg4[%c0_6, %c0_7] : memref<32x128xf32, #tpu.memory_space<vmem>>, vector<32x128xf32>
    %cst_8 = arith.constant dense<0.000000e+00> : vector<512x128xf32>
    %9 = tpu.matmul %7, %8, %cst_8 {dimension_numbers = #tpu.dot_dimension_numbers<[1], [0], [0], [1], [0, 0, 1, 1], [], []>} : vector<512x32xf32>, vector<32x128xf32>, vector<512x128xf32> -> vector<512x128xf32>
    %c0_9 = arith.constant 0 : index
    %c0_10 = arith.constant 0 : index
    %10 = vector.load %arg5[%c0_9, %c0_10] : memref<1x128xf32, #tpu.memory_space<vmem>>, vector<1x128xf32>
    %11 = vector.broadcast %10 : vector<1x128xf32> to vector<512x128xf32>
    %12 = arith.addf %9, %11 : vector<512x128xf32>
    %c0_11 = arith.constant 0 : index
    %c0_12 = arith.constant 0 : index
    %13 = vector.load %arg6[%c0_11, %c0_12] : memref<1x128xf32, #tpu.memory_space<vmem>>, vector<1x128xf32>
    %14 = vector.broadcast %13 : vector<1x128xf32> to vector<512x128xf32>
    %15 = arith.mulf %12, %14 : vector<512x128xf32>
    %cst_13 = arith.constant dense<0.000000e+00> : vector<512xf32>
    %16 = vector.multi_reduction <add>, %15, %cst_13 [1] : vector<512x128xf32> to vector<512xf32>
    %17 = vector.shape_cast %16 : vector<512xf32> to vector<512x1xf32>
    %18 = arith.negf %17 : vector<512x1xf32>
    %19 = math.exp %18 : vector<512x1xf32>
    %cst_14 = arith.constant 1.000000e+00 : f32
    %20 = vector.broadcast %cst_14 : f32 to vector<512x1xf32>
    %21 = arith.addf %20, %19 : vector<512x1xf32>
    %22 = arith.divf %20, %21 : vector<512x1xf32>
    %23 = arith.truncf %12 : vector<512x128xf32> to vector<512x128xbf16>
    %c0_15 = arith.constant 0 : index
    %c0_16 = arith.constant 0 : index
    %24 = vector.load %arg7[%c0_15, %c0_16] : memref<512x128xbf16, #tpu.memory_space<vmem>>, vector<512x128xbf16>
    tpu.vector_store %arg7[%c0_15, %c0_16], %23 {strides = array<i32>} : memref<512x128xbf16, #tpu.memory_space<vmem>>, vector<512x128xbf16>,
    %25 = vector.broadcast %22 : vector<512x1xf32> to vector<512x128xf32>
    %26 = arith.mulf %25, %12 : vector<512x128xf32>
    %c0_17 = arith.constant 0 : index
    %c0_18 = arith.constant 0 : index
    %27 = vector.load %arg8[%c0_17, %c0_18] : memref<512x128xf32, #tpu.memory_space<vmem>>, vector<512x128xf32>
    tpu.vector_store %arg8[%c0_17, %c0_18], %26 {strides = array<i32>} : memref<512x128xf32, #tpu.memory_space<vmem>>, vector<512x128xf32>,
    return
  }
  func.func @transform_0(%arg0: i32) -> (i32, i32) {
    %c0_i32 = arith.constant 0 : i32
    %c0_i32_0 = arith.constant 0 : i32
    return %arg0, %c0_i32 : i32, i32
  }
  func.func @transform_1(%arg0: i32) -> (i32, i32) {
    %c0_i32 = arith.constant 0 : i32
    %c0_i32_0 = arith.constant 0 : i32
    %c0_i32_1 = arith.constant 0 : i32
    return %c0_i32, %c0_i32_0 : i32, i32
  }
  func.func @transform_2(%arg0: i32) -> (i32, i32) {
    %c0_i32 = arith.constant 0 : i32
    %c0_i32_0 = arith.constant 0 : i32
    %c0_i32_1 = arith.constant 0 : i32
    return %c0_i32, %c0_i32_0 : i32, i32
  }
  func.func @transform_3(%arg0: i32) -> (i32, i32) {
    %c0_i32 = arith.constant 0 : i32
    %c0_i32_0 = arith.constant 0 : i32
    %c0_i32_1 = arith.constant 0 : i32
    return %c0_i32, %c0_i32_0 : i32, i32
  }
  func.func @transform_4(%arg0: i32) -> (i32, i32) {
    %c0_i32 = arith.constant 0 : i32
    %c0_i32_0 = arith.constant 0 : i32
    %c0_i32_1 = arith.constant 0 : i32
    return %c0_i32, %c0_i32_0 : i32, i32
  }
  func.func @transform_5(%arg0: i32) -> (i32, i32) {
    %c0_i32 = arith.constant 0 : i32
    %c0_i32_0 = arith.constant 0 : i32
    %c0_i32_1 = arith.constant 0 : i32
    return %c0_i32, %c0_i32_0 : i32, i32
  }
  func.func @transform_6(%arg0: i32) -> (i32, i32) {
    %c0_i32 = arith.constant 0 : i32
    %c0_i32_0 = arith.constant 0 : i32
    return %arg0, %c0_i32 : i32, i32
  }
  func.func @transform_7(%arg0: i32) -> (i32, i32) {
    %c0_i32 = arith.constant 0 : i32
    %c0_i32_0 = arith.constant 0 : i32
    return %arg0, %c0_i32 : i32, i32
  }
}

</mosaic_0001>

<bundles_post_ra>
// kernel: tpu_custom_call.1
= control target key start
LH: loop header
LB: loop body
LE: loop exit
PB: predicated region body
PF: predicated region fallthrough
CT: control target
= control target key end

     0   :  { %13 = vsyncpa [#allocation3], 0  ;;  %s5063_s0 = inlined_call_operand.vmem [shape: f32[1024,16], index: 0, kind: input, shape index: {}]   ;;  %s5064_s1 = inlined_call_operand.vmem [shape: f32[16,32], index: 1, kind: input, shape index: {}]   ;;  %s5065_s2 = inlined_call_operand.vmem [shape: f32[1,32], index: 2, kind: input, shape index: {}]   ;;  %s5066_s3 = inlined_call_operand.vmem [shape: f32[32,128], index: 3, kind: input, shape index: {}]   ;;  %s5067_s4 = inlined_call_operand.vmem [shape: f32[1,128], index: 4, kind: input, shape index: {}]   ;;  %s5068_s5 = inlined_call_operand.vmem [shape: f32[1,128], index: 5, kind: input, shape index: {}]   ;;  %s5069_s6 = inlined_call_operand.hbm [shape: bf16[1024,128], index: 6, kind: output, shape index: {0}]   ;;  %s5070_s7 = inlined_call_operand.hbm [shape: f32[1024,128], index: 7, kind: output, shape index: {1}]  }
   0x1   :  { %15 = vsyncpa [#allocation3 + $0x1], 0 }
   0x2   :  { %16 = vsyncpa [#allocation5], 0 }
   0x3   :  { %18 = vsyncpa [#allocation5 + $0x1], 0  ;;  %s4084_s24 = smov 0   ;;  %s4086_s25 = smov 0  }
   0x4   :  { %s4088_s26 = smov 0   ;;  %s4090_s27 = smov 0  }
   0x5 LB: > { %s4105_s28 = sadd.s32 4294967295, %s4036_s27   ;;  %s2756_s29 = sadd.s32 4294967294, %s4036_s27   ;;  %s4036_s27 = sphi %s4090_s27, %s5127_s27   ;;  %s4032_s26 = sphi %s4088_s26, %s5126_s26   ;;  %s4028_s25 = sphi %s4086_s25, %s5125_s25   ;;  %s4024_s24 = sphi %s4084_s24, %s5124_s24  }
   0x6   : > { %s4109_s30 = sadd.s32 1, %s4036_s27   ;;  %s162_s8 = sadd.s32 1, %s4032_s26 }
   0x7   : > { %s159_s9 = ssub.s32 %s4036_s27, %s4109_s30  ;;  %p172_p0 = scmp.ne.s32.totalorder %s4032_s26, %s4028_s25 }
   0x8   : > { %p160_p1 = scmp.eq.s32.totalorder %s159_s9, 0  ;;  %p173_p2 = scmp.eq.s32.totalorder %s4105_s28, 1 }
   0x9   : > { %p178_p3 = scmp.ne.s32.totalorder %s4028_s25, %s4024_s24  ;;  %p179_p4 = scmp.eq.s32.totalorder %s2756_s29, 1 }
   0xa   : > { %s4120_s10 = scalar_select %p160_p1, %s4032_s26, %s162_s8  }
   0xb   : > { %p4122_p5 = por %p173_p2, %p172_p0  ;;  %p4126_p6 = por %p179_p4, %p178_p3 }
   0xc   : > { %p2759_p7 = scmp.ge.s32.totalorder %s4036_s27, 1  ;;  %p247_p8 = scmp.lt.s32.totalorder %s4036_s27, 3 }
   0xe   : > { %p248_p9 = pnand %p2759_p7, %p247_p8 }
  0x10   : > { %251 = sbr.rel (%p248_p9) target bundleno = 790 (0x316), region = 44 }
  0x17   : > { %v356_v0 = vld [vmem:[%s5064_s1] sm:$0xff]  ;;  %v357_v1 = vld [vmem:[%s5064_s1 + $0x8] sm:$0xff]  ;;  %s2762_s17 = sshll.u32 %s4105_s28, 6  ;;  %vm365_vm0 = vcmask 130048   ;;  %v1009_v51 = vld [vmem:[%s5066_s3 + $0x10] sm:$0xff]  ;;  %vm1018_vm1 = vcmask 261120  }
  0x18   : > { %v3626_v2 = vpack.c.bf16 %v357_v1, %v356_v0  ;;  %p285_p10 = scmp.lt.s32.totalorder %s2762_s17, 127  ;;  %v1007_v3 = vld [vmem:[%s5066_s3] sm:$0xff]  ;;  %v1008_v4 = vld [vmem:[%s5066_s3 + $0x8] sm:$0xff]  ;;  %v1010_v52 = vld [vmem:[%s5066_s3 + $0x18] sm:$0xff]  ;;  %s3095_s13 = sshll.u32 %s4105_s28, 12 }
  0x19   : > { %v3630_v5 = vpack.c.bf16 %v1008_v4, %v1007_v3  ;;  %v3634_v53 = vpack.c.bf16 %v1010_v52, %v1009_v51 }
  0x1a   : > { %3627 = vmatprep.subr.bf16.mxu0 %v3626_v2  ;;  %s5129_s17 = smov (!%p285_p10, %s2762_s17), 127 }
  0x1b   : > { %3629 = vmatpush3.bf16.msra.mxu0 %v3626_v2  ;;  %s2763_s18 = sshll.u32 %s5129_s17, 3  ;;  %3631 = vmatprep.subr.bf16.mxu1 %v3630_v5  ;;  %s4860_s17 = scalar_lea.hbm %s5069_s6, %s3095_s13 }
  0x1c   : > { %s4148_s8 = scalar_lea.vmem %s5063_s0, %s2763_s18  ;;  %3633 = vmatpush3.bf16.msra.mxu1 %v3630_v5  ;;  %s4418_s18 = sand.u32 1, %s4028_s25  }
  0x1d   : > { %v292_v6 = vld [vmem:[%s4148_s8] sm:$0xff]  ;;  %v293_v7 = vld [vmem:[%s4148_s8 + $0x8] sm:$0xff]  ;;  %v294_v8 = vld [vmem:[%s4148_s8 + $0x10] sm:$0xff]  ;;  %3635 = vmatprep.subr.bf16.mxu1 %v3634_v53  ;;  %s2760_s21 = sshll.u32 %s4418_s18, 8  ;;  %s2628_s19 = scalar_lea.sflag [#allocation3], %s4418_s18 }
  0x1e   : > { %3426 = vmatprep.mubr.msk.f32.mxu0 %vm365_vm0, %v292_v6  ;;  %v295_v9 = vld [vmem:[%s4148_s8 + $0x18] sm:$0xff]  ;;  %v296_v10 = vld [vmem:[%s4148_s8 + $0x20] sm:$0xff]  ;;  %v297_v11 = vld [vmem:[%s4148_s8 + $0x28] sm:$0xff]  ;;  %s4444_s29 = scalar_lea.vmem [#allocation2], %s2760_s21  ;;  %s4038_s21 = smov [#allocation2]  }
  0x1f   : > { %3427 = vmatmul.mubr.msk.f32.vlgmr.msra.gmra.mrb[0].mxu0 %vm365_vm0, %v293_v7  ;;  %v298_v12 = vld [vmem:[%s4148_s8 + $0x30] sm:$0xff]  ;;  %v299_v13 = vld [vmem:[%s4148_s8 + $0x38] sm:$0xff]  ;;  %v300_v14 = vld [vmem:[%s4148_s8 + $0x40] sm:$0xff]  ;;  %s2646_s14 = sshll.u32 %s4444_s29, 4  ;;  %s3946_s22 = sshll.u32 %s4038_s21, 4  ;;  %s4862_s14 = int_to_ptr.vmem [resolvable:$true] %s2646_s14  ;;  %s3947_s22 = int_to_ptr.vmem [resolvable:$false] %s3946_s22 }
  0x20   : > { %3429 = vmatprep.mubr.msk.f32.mxu0 %vm365_vm0, %v294_v8  ;;  %v301_v15 = vld [vmem:[%s4148_s8 + $0x48] sm:$0xff]  ;;  %v302_v16 = vld [vmem:[%s4148_s8 + $0x50] sm:$0xff]  ;;  %v303_v17 = vld [vmem:[%s4148_s8 + $0x58] sm:$0xff]  ;;  %3637 = vmatpush3.bf16.msra.mxu1 %v3634_v53  ;;  %s3942_s20 = scalar_lea.vmem %s4862_s14, 4096  ;;  %s3948_s23 = scalar_lea.vmem %s3947_s22, 8192 }
  0x21   : > { %v304_v18 = vld [vmem:[%s4148_s8 + $0x60] sm:$0xff]  ;;  %v305_v19 = vld [vmem:[%s4148_s8 + $0x68] sm:$0xff]  ;;  %v306_v20 = vld [vmem:[%s4148_s8 + $0x70] sm:$0xff]  ;;  %p3943_p11 = scmp.ne.s32.totalorder %s4862_s14, %s3942_s20  ;;  %p3949_p0 = scmp.lt.s32.totalorder %s4862_s14, %s3947_s22 }
  0x22   : > { %v307_v21 = vld [vmem:[%s4148_s8 + $0x78] sm:$0xff]  ;;  %v308_v22 = vld [vmem:[%s4148_s8 + $0x80] sm:$0xff]  ;;  %v309_v23 = vld [vmem:[%s4148_s8 + $0x88] sm:$0xff]  ;;  %p3950_p1 = scmp.lt.s32.totalorder %s3948_s23, %s3942_s20 }
  0x23   : > { %3430 = vmatmul.mubr.msk.f32.gmra.mrb[2].mxu0 %vm365_vm0, %v295_v9  ;;  %v310_v24 = vld [vmem:[%s4148_s8 + $0x90] sm:$0xff]  ;;  %v311_v25 = vld [vmem:[%s4148_s8 + $0x98] sm:$0xff]  ;;  %v312_v26 = vld [vmem:[%s4148_s8 + $0xa0] sm:$0xff]  ;;  %p3944_p12 = pnand %p3943_p11, %p4122_p5 }
  0x24   : > { %3432 = vmatprep.mubr.msk.f32.mxu0 %vm365_vm0, %v296_v10  ;;  %v313_v27 = vld [vmem:[%s4148_s8 + $0xa8] sm:$0xff]  ;;  %v314_v28 = vld [vmem:[%s4148_s8 + $0xb0] sm:$0xff]  ;;  %v315_v29 = vld [vmem:[%s4148_s8 + $0xb8] sm:$0xff]  ;;  %p3951_p2 = por %p3950_p1, %p3949_p0 }
  0x25   : > { %v316_v30 = vld [vmem:[%s4148_s8 + $0xc0] sm:$0xff]  ;;  %v317_v31 = vld [vmem:[%s4148_s8 + $0xc8] sm:$0xff]  ;;  %v318_v32 = vld [vmem:[%s4148_s8 + $0xd0] sm:$0xff]  ;;  %p3945_p13 = pneg %p3944_p12 }
  0x26   : > { %v319_v33 = vld [vmem:[%s4148_s8 + $0xd8] sm:$0xff]  ;;  %v320_v34 = vld [vmem:[%s4148_s8 + $0xe0] sm:$0xff]  ;;  %v321_v35 = vld [vmem:[%s4148_s8 + $0xe8] sm:$0xff] }
  0x27   : > { %3433 = vmatmul.mubr.msk.f32.gmra.mrb[4].mxu0 %vm365_vm0, %v297_v11  ;;  %v322_v36 = vld [vmem:[%s4148_s8 + $0xf0] sm:$0xff]  ;;  %v323_v37 = vld [vmem:[%s4148_s8 + $0xf8] sm:$0xff]  ;;  %v324_v38 = vld [vmem:[%s4148_s8 + $0x100] sm:$0xff]  ;;  %p3952_p3 = pnand %p3951_p2, %p3945_p13 }
  0x28   : > { %3435 = vmatprep.mubr.msk.f32.mxu0 %vm365_vm0, %v298_v12  ;;  %v325_v39 = vld [vmem:[%s4148_s8 + $0x108] sm:$0xff]  ;;  %v326_v40 = vld [vmem:[%s4148_s8 + $0x110] sm:$0xff]  ;;  %v327_v41 = vld [vmem:[%s4148_s8 + $0x118] sm:$0xff] }
  0x29   : > { %v328_v42 = vld [vmem:[%s4148_s8 + $0x120] sm:$0xff]  ;;  %v329_v43 = vld [vmem:[%s4148_s8 + $0x128] sm:$0xff]  ;;  %v330_v44 = vld [vmem:[%s4148_s8 + $0x130] sm:$0xff] }
  0x2a   : > { %v331_v45 = vld [vmem:[%s4148_s8 + $0x138] sm:$0xff]  ;;  %v332_v46 = vld [vmem:[%s4148_s8 + $0x140] sm:$0xff]  ;;  %v333_v47 = vld [vmem:[%s4148_s8 + $0x148] sm:$0xff] }
  0x2b   : > { %3436 = vmatmul.mubr.msk.f32.gmra.mrb[6].mxu0 %vm365_vm0, %v299_v13  ;;  %v334_v48 = vld [vmem:[%s4148_s8 + $0x150] sm:$0xff]  ;;  %v335_v49 = vld [vmem:[%s4148_s8 + $0x158] sm:$0xff]  ;;  %v336_v50 = vld [vmem:[%s4148_s8 + $0x160] sm:$0xff] }
  0x2c   : > { %3438 = vmatprep.mubr.msk.f32.mxu0 %vm365_vm0, %v300_v14  ;;  %v337_v54 = vld [vmem:[%s4148_s8 + $0x168] sm:$0xff]  ;;  %v338_v55 = vld [vmem:[%s4148_s8 + $0x170] sm:$0xff]  ;;  %v339_v56 = vld [vmem:[%s4148_s8 + $0x178] sm:$0xff] }
  0x2d   : > { %v340_v57 = vld [vmem:[%s4148_s8 + $0x180] sm:$0xff]  ;;  %v341_v58 = vld [vmem:[%s4148_s8 + $0x188] sm:$0xff]  ;;  %v342_v59 = vld [vmem:[%s4148_s8 + $0x190] sm:$0xff] }
  0x2e   : > { %v343_v60 = vld [vmem:[%s4148_s8 + $0x198] sm:$0xff]  ;;  %v344_v61 = vld [vmem:[%s4148_s8 + $0x1a0] sm:$0xff]  ;;  %v345_v62 = vld [vmem:[%s4148_s8 + $0x1a8] sm:$0xff] }
  0x2f   : > { %3439 = vmatmul.mubr.msk.f32.gmra.mrb[8].mxu0 %vm365_vm0, %v301_v15  ;;  %v346_v63 = vld [vmem:[%s4148_s8 + $0x1b0] sm:$0xff]  ;;  %v347_v0 = vld [vmem:[%s4148_s8 + $0x1b8] sm:$0xff]  ;;  %v348_v1 = vld [vmem:[%s4148_s8 + $0x1c0] sm:$0xff] }
  0x30   : > { %3441 = vmatprep.mubr.msk.f32.mxu0 %vm365_vm0, %v302_v16  ;;  %v349_v2 = vld [vmem:[%s4148_s8 + $0x1c8] sm:$0xff]  ;;  %v350_v3 = vld [vmem:[%s4148_s8 + $0x1d0] sm:$0xff]  ;;  %v351_v4 = vld [vmem:[%s4148_s8 + $0x1d8] sm:$0xff] }
  0x31   : > { %v352_v5 = vld [vmem:[%s4148_s8 + $0x1e0] sm:$0xff]  ;;  %v353_v6 = vld [vmem:[%s4148_s8 + $0x1e8] sm:$0xff]  ;;  %v354_v7 = vld [vmem:[%s4148_s8 + $0x1f0] sm:$0xff] }
  0x32   : > { %v355_v8 = vld [vmem:[%s4148_s8 + $0x1f8] sm:$0xff]  ;;  %v4287_v9 = vld [vmem:[%s5065_s2] ss:$0 sm:$0xff]  ;;  %s2761_s8 = sshll.u32 %s4418_s18, 9 }
  0x33   : > { %3442 = vmatmul.mubr.msk.f32.gmra.mrb[10].mxu0 %vm365_vm0, %v303_v17  ;;  %s4851_s9 = scalar_lea.vmem [#allocation4], %s2761_s8 }
  0x34   : > { %3444 = vmatprep.mubr.msk.f32.mxu0 %vm365_vm0, %v304_v18 }
  0x37   : > { %3445 = vmatmul.mubr.msk.f32.gmra.mrb[12].mxu0 %vm365_vm0, %v305_v19 }
  0x38   : > { %3447 = vmatprep.mubr.msk.f32.mxu0 %vm365_vm0, %v306_v20 }
  0x3b   : > { %3448 = vmatmul.mubr.msk.f32.gmra.mrb[14].mxu0 %vm365_vm0, %v307_v21 }
  0x3c   : > { %3450 = vmatprep.mubr.msk.f32.mxu0 %vm365_vm0, %v308_v22 }
  0x3f   : > { %3451 = vmatmul.mubr.msk.f32.gmra.mrb[16].mxu0 %vm365_vm0, %v309_v23 }
  0x40   : > { %3453 = vmatprep.mubr.msk.f32.mxu0 %vm365_vm0, %v310_v24 }
  0x43   : > { %3454 = vmatmul.mubr.msk.f32.gmra.mrb[18].mxu0 %vm365_vm0, %v311_v25 }
  0x44   : > { %3456 = vmatprep.mubr.msk.f32.mxu0 %vm365_vm0, %v312_v26 }
  0x47   : > { %3457 = vmatmul.mubr.msk.f32.gmra.mrb[20].mxu0 %vm365_vm0, %v313_v27 }
  0x48   : > { %3459 = vmatprep.mubr.msk.f32.mxu0 %vm365_vm0, %v314_v28 }
  0x4b   : > { %3460 = vmatmul.mubr.msk.f32.gmra.mrb[22].mxu0 %vm365_vm0, %v315_v29 }
  0x4c   : > { %3462 = vmatprep.mubr.msk.f32.mxu0 %vm365_vm0, %v316_v30 }
  0x4f   : > { %3463 = vmatmul.mubr.msk.f32.gmra.mrb[24].mxu0 %vm365_vm0, %v317_v31 }
  0x50   : > { %3465 = vmatprep.mubr.msk.f32.mxu0 %vm365_vm0, %v318_v32 }
  0x53   : > { %3466 = vmatmul.mubr.msk.f32.gmra.mrb[26].mxu0 %vm365_vm0, %v319_v33 }
  0x54   : > { %3468 = vmatprep.mubr.msk.f32.mxu0 %vm365_vm0, %v320_v34 }
  0x57   : > { %3469 = vmatmul.mubr.msk.f32.gmra.mrb[28].mxu0 %vm365_vm0, %v321_v35 }
  0x58   : > { %3471 = vmatprep.mubr.msk.f32.mxu0 %vm365_vm0, %v322_v36 }
  0x5b   : > { %3472 = vmatmul.mubr.msk.f32.gmra.mrb[30].mxu0 %vm365_vm0, %v323_v37 }
  0x5c   : > { %3474 = vmatprep.mubr.msk.f32.mxu0 %vm365_vm0, %v324_v38 }
  0x5f   : > { %3475 = vmatmul.mubr.msk.f32.gmra.mrb[32].mxu0 %vm365_vm0, %v325_v39 }
  0x60   : > { %3477 = vmatprep.mubr.msk.f32.mxu0 %vm365_vm0, %v326_v40 }
  0x63   : > { %3478 = vmatmul.mubr.msk.f32.gmra.mrb[34].mxu0 %vm365_vm0, %v327_v41 }
  0x64   : > { %3480 = vmatprep.mubr.msk.f32.mxu0 %vm365_vm0, %v328_v42 }
  0x67   : > { %3481 = vmatmul.mubr.msk.f32.gmra.mrb[36].mxu0 %vm365_vm0, %v329_v43 }
  0x68   : > { %3483 = vmatprep.mubr.msk.f32.mxu0 %vm365_vm0, %v330_v44 }
  0x6b   : > { %3484 = vmatmul.mubr.msk.f32.gmra.mrb[38].mxu0 %vm365_vm0, %v331_v45 }
  0x6c   : > { %3486 = vmatprep.mubr.msk.f32.mxu0 %vm365_vm0, %v332_v46 }
  0x6f   : > { %3487 = vmatmul.mubr.msk.f32.gmra.mrb[40].mxu0 %vm365_vm0, %v333_v47 }
  0x70   : > { %3489 = vmatprep.mubr.msk.f32.mxu0 %vm365_vm0, %v334_v48 }
  0x73   : > { %3490 = vmatmul.mubr.msk.f32.gmra.mrb[42].mxu0 %vm365_vm0, %v335_v49 }
  0x74   : > { %3492 = vmatprep.mubr.msk.f32.mxu0 %vm365_vm0, %v336_v50 }
  0x77   : > { %3493 = vmatmul.mubr.msk.f32.gmra.mrb[44].mxu0 %vm365_vm0, %v337_v54 }
  0x78   : > { %3495 = vmatprep.mubr.msk.f32.mxu0 %vm365_vm0, %v338_v55 }
  0x7b   : > { %3496 = vmatmul.mubr.msk.f32.gmra.mrb[46].mxu0 %vm365_vm0, %v339_v56 }
  0x7c   : > { %3498 = vmatprep.mubr.msk.f32.mxu0 %vm365_vm0, %v340_v57 }
  0x7f   : > { %3499 = vmatmul.mubr.msk.f32.gmra.mrb[48].mxu0 %vm365_vm0, %v341_v58 }
  0x80   : > { %3501 = vmatprep.mubr.msk.f32.mxu0 %vm365_vm0, %v342_v59 }
  0x83   : > { %3502 = vmatmul.mubr.msk.f32.gmra.mrb[50].mxu0 %vm365_vm0, %v343_v60 }
  0x84   : > { %3504 = vmatprep.mubr.msk.f32.mxu0 %vm365_vm0, %v344_v61 }
  0x87   : > { %3505 = vmatmul.mubr.msk.f32.gmra.mrb[52].mxu0 %vm365_vm0, %v345_v62 }
  0x88   : > { %3507 = vmatprep.mubr.msk.f32.mxu0 %vm365_vm0, %v346_v63 }
  0x8b   : > { %3508 = vmatmul.mubr.msk.f32.gmra.mrb[54].mxu0 %vm365_vm0, %v347_v0 }
  0x8c   : > { %3510 = vmatprep.mubr.msk.f32.mxu0 %vm365_vm0, %v348_v1 }
  0x8f   : > { %3511 = vmatmul.mubr.msk.f32.gmra.mrb[56].mxu0 %vm365_vm0, %v349_v2 }
  0x90   : > { %3513 = vmatprep.mubr.msk.f32.mxu0 %vm365_vm0, %v350_v3 }
  0x93   : > { %3514 = vmatmul.mubr.msk.f32.gmra.mrb[58].mxu0 %vm365_vm0, %v351_v4 }
  0x94   : > { %3516 = vmatprep.mubr.msk.f32.mxu0 %vm365_vm0, %v352_v5 }
  0x97   : > { %3517 = vmatmul.mubr.msk.f32.gmra.mrb[60].mxu0 %vm365_vm0, %v353_v6 }
  0x98   : > { %3519 = vmatprep.mubr.msk.f32.mxu0 %vm365_vm0, %v354_v7 }
  0x9b   : > { %3520 = vmatmul.mubr.msk.f32.gmra.mrb[62].mxu0 %vm365_vm0, %v355_v8 }
  0xf2   : > { %v3428_v10 = vpop.f32.mrb[0].mxu0 }
  0xf3   : > { %v630_v11 = vadd.f32 %v3428_v10, %v4287_v9  ;;  %v624_v12 = vpop.f32.mrb[1].mxu0 }
  0xf4   : > { %v625_v13 = vadd.f32 %v4287_v9, %v624_v12 }
  0xf5   : > { %v944_v16 = vmax.f32 %v630_v11, 0.0 }
  0xf6   : > { %v943_v14 = vmax.f32 %v625_v13, 0.0  ;;  %v3431_v15 = vpop.f32.mrb[2].mxu0 }
  0xf7   : > { %v640_v17 = vadd.f32 %v3431_v15, %v4287_v9  ;;  %v634_v18 = vpop.f32.mrb[3].mxu0 }
  0xf8   : > { %v635_v19 = vadd.f32 %v4287_v9, %v634_v18  ;;  %3530 = vmatprep.mubr.msk.f32.mxu1 %vm1018_vm1, %v943_v14 }
  0xf9   : > { %3531 = vmatmul.mubr.msk.f32.vlgmr.msra.gmra.mrb[0].mxu1 %vm1018_vm1, %v944_v16  ;;  %v946_v22 = vmax.f32 %v640_v17, 0.0 }
  0xfa   : > { %v945_v20 = vmax.f32 %v635_v19, 0.0  ;;  %v3434_v21 = vpop.f32.mrb[4].mxu0 }
  0xfb   : > { %v650_v23 = vadd.f32 %v3434_v21, %v4287_v9  ;;  %v644_v24 = vpop.f32.mrb[5].mxu0 }
  0xfc   : > { %v645_v25 = vadd.f32 %v4287_v9, %v644_v24  ;;  %3533 = vmatprep.mubr.msk.f32.mxu1 %vm1018_vm1, %v945_v20 }
  0xfd   : > { %v948_v26 = vmax.f32 %v650_v23, 0.0  ;;  %3534 = vmatmul.mubr.msk.f32.gmra.mrb[2].mxu1 %vm1018_vm1, %v946_v22 }
  0xfe   : > { %v947_v27 = vmax.f32 %v645_v25, 0.0  ;;  %v3437_v28 = vpop.f32.mrb[6].mxu0 }
  0xff   : > { %v660_v29 = vadd.f32 %v3437_v28, %v4287_v9  ;;  %v654_v30 = vpop.f32.mrb[7].mxu0 }
 0x100   : > { %v655_v31 = vadd.f32 %v4287_v9, %v654_v30  ;;  %3536 = vmatprep.mubr.msk.f32.mxu1 %vm1018_vm1, %v947_v27 }
 0x101   : > { %v950_v32 = vmax.f32 %v660_v29, 0.0  ;;  %3537 = vmatmul.mubr.msk.f32.gmra.mrb[4].mxu1 %vm1018_vm1, %v948_v26 }
 0x102   : > { %v949_v33 = vmax.f32 %v655_v31, 0.0  ;;  %v3440_v34 = vpop.f32.mrb[8].mxu0 }
 0x103   : > { %v670_v35 = vadd.f32 %v3440_v34, %v4287_v9  ;;  %v664_v36 = vpop.f32.mrb[9].mxu0 }
 0x104   : > { %v665_v37 = vadd.f32 %v4287_v9, %v664_v36  ;;  %3539 = vmatprep.mubr.msk.f32.mxu1 %vm1018_vm1, %v949_v33 }
 0x105   : > { %v952_v38 = vmax.f32 %v670_v35, 0.0  ;;  %3540 = vmatmul.mubr.msk.f32.gmra.mrb[6].mxu1 %vm1018_vm1, %v950_v32 }
 0x106   : > { %v951_v39 = vmax.f32 %v665_v37, 0.0  ;;  %v3443_v40 = vpop.f32.mrb[10].mxu0 }
 0x107   : > { %v680_v41 = vadd.f32 %v3443_v40, %v4287_v9  ;;  %v674_v42 = vpop.f32.mrb[11].mxu0 }
 0x108   : > { %v675_v43 = vadd.f32 %v4287_v9, %v674_v42  ;;  %3542 = vmatprep.mubr.msk.f32.mxu1 %vm1018_vm1, %v951_v39 }
 0x109   : > { %v954_v44 = vmax.f32 %v680_v41, 0.0  ;;  %3543 = vmatmul.mubr.msk.f32.gmra.mrb[8].mxu1 %vm1018_vm1, %v952_v38 }
 0x10a   : > { %v953_v45 = vmax.f32 %v675_v43, 0.0  ;;  %v3446_v46 = vpop.f32.mrb[12].mxu0 }
 0x10b   : > { %v690_v47 = vadd.f32 %v3446_v46, %v4287_v9  ;;  %v684_v48 = vpop.f32.mrb[13].mxu0 }
 0x10c   : > { %v685_v49 = vadd.f32 %v4287_v9, %v684_v48  ;;  %3545 = vmatprep.mubr.msk.f32.mxu1 %vm1018_vm1, %v953_v45 }
 0x10d   : > { %v956_v50 = vmax.f32 %v690_v47, 0.0  ;;  %3546 = vmatmul.mubr.msk.f32.gmra.mrb[10].mxu1 %vm1018_vm1, %v954_v44 }
 0x10e   : > { %v955_v51 = vmax.f32 %v685_v49, 0.0  ;;  %v3449_v52 = vpop.f32.mrb[14].mxu0 }
 0x10f   : > { %v700_v53 = vadd.f32 %v3449_v52, %v4287_v9  ;;  %v694_v54 = vpop.f32.mrb[15].mxu0 }
 0x110   : > { %v695_v55 = vadd.f32 %v4287_v9, %v694_v54  ;;  %3548 = vmatprep.mubr.msk.f32.mxu1 %vm1018_vm1, %v955_v51 }
 0x111   : > { %v958_v56 = vmax.f32 %v700_v53, 0.0  ;;  %3549 = vmatmul.mubr.msk.f32.gmra.mrb[12].mxu1 %vm1018_vm1, %v956_v50 }
 0x112   : > { %v957_v57 = vmax.f32 %v695_v55, 0.0  ;;  %v3452_v58 = vpop.f32.mrb[16].mxu0 }
 0x113   : > { %v710_v59 = vadd.f32 %v3452_v58, %v4287_v9  ;;  %v704_v60 = vpop.f32.mrb[17].mxu0 }
 0x114   : > { %v705_v61 = vadd.f32 %v4287_v9, %v704_v60  ;;  %3551 = vmatprep.mubr.msk.f32.mxu1 %vm1018_vm1, %v957_v57 }
 0x115   : > { %v960_v62 = vmax.f32 %v710_v59, 0.0  ;;  %3552 = vmatmul.mubr.msk.f32.gmra.mrb[14].mxu1 %vm1018_vm1, %v958_v56 }
 0x116   : > { %v959_v63 = vmax.f32 %v705_v61, 0.0  ;;  %v3455_v0 = vpop.f32.mrb[18].mxu0 }
 0x117   : > { %v720_v1 = vadd.f32 %v3455_v0, %v4287_v9  ;;  %v714_v2 = vpop.f32.mrb[19].mxu0 }
 0x118   : > { %v715_v3 = vadd.f32 %v4287_v9, %v714_v2  ;;  %3554 = vmatprep.mubr.msk.f32.mxu1 %vm1018_vm1, %v959_v63 }
 0x119   : > { %v962_v4 = vmax.f32 %v720_v1, 0.0  ;;  %3555 = vmatmul.mubr.msk.f32.gmra.mrb[16].mxu1 %vm1018_vm1, %v960_v62 }
 0x11a   : > { %v961_v5 = vmax.f32 %v715_v3, 0.0  ;;  %v3458_v6 = vpop.f32.mrb[20].mxu0 }
 0x11b   : > { %v730_v7 = vadd.f32 %v3458_v6, %v4287_v9  ;;  %v724_v8 = vpop.f32.mrb[21].mxu0 }
 0x11c   : > { %v725_v10 = vadd.f32 %v4287_v9, %v724_v8  ;;  %3557 = vmatprep.mubr.msk.f32.mxu1 %vm1018_vm1, %v961_v5 }
 0x11d   : > { %v964_v11 = vmax.f32 %v730_v7, 0.0  ;;  %3558 = vmatmul.mubr.msk.f32.gmra.mrb[18].mxu1 %vm1018_vm1, %v962_v4 }
 0x11e   : > { %v963_v12 = vmax.f32 %v725_v10, 0.0  ;;  %v3461_v13 = vpop.f32.mrb[22].mxu0 }
 0x11f   : > { %v740_v14 = vadd.f32 %v3461_v13, %v4287_v9  ;;  %v734_v15 = vpop.f32.mrb[23].mxu0 }
 0x120   : > { %v735_v16 = vadd.f32 %v4287_v9, %v734_v15  ;;  %3560 = vmatprep.mubr.msk.f32.mxu1 %vm1018_vm1, %v963_v12 }
 0x121   : > { %v966_v17 = vmax.f32 %v740_v14, 0.0  ;;  %3561 = vmatmul.mubr.msk.f32.gmra.mrb[20].mxu1 %vm1018_vm1, %v964_v11 }
 0x122   : > { %v965_v18 = vmax.f32 %v735_v16, 0.0  ;;  %v3464_v19 = vpop.f32.mrb[24].mxu0 }
 0x123   : > { %v750_v20 = vadd.f32 %v3464_v19, %v4287_v9  ;;  %v744_v21 = vpop.f32.mrb[25].mxu0 }
 0x124   : > { %v745_v22 = vadd.f32 %v4287_v9, %v744_v21  ;;  %3563 = vmatprep.mubr.msk.f32.mxu1 %vm1018_vm1, %v965_v18 }
 0x125   : > { %v968_v23 = vmax.f32 %v750_v20, 0.0  ;;  %3564 = vmatmul.mubr.msk.f32.gmra.mrb[22].mxu1 %vm1018_vm1, %v966_v17 }
 0x126   : > { %v967_v24 = vmax.f32 %v745_v22, 0.0  ;;  %v3467_v25 = vpop.f32.mrb[26].mxu0 }
 0x127   : > { %v760_v26 = vadd.f32 %v3467_v25, %v4287_v9  ;;  %v754_v27 = vpop.f32.mrb[27].mxu0 }
 0x128   : > { %v755_v28 = vadd.f32 %v4287_v9, %v754_v27  ;;  %3566 = vmatprep.mubr.msk.f32.mxu1 %vm1018_vm1, %v967_v24 }
 0x129   : > { %v970_v29 = vmax.f32 %v760_v26, 0.0  ;;  %3567 = vmatmul.mubr.msk.f32.gmra.mrb[24].mxu1 %vm1018_vm1, %v968_v23 }
 0x12a   : > { %v969_v30 = vmax.f32 %v755_v28, 0.0  ;;  %v3470_v31 = vpop.f32.mrb[28].mxu0 }
 0x12b   : > { %v770_v32 = vadd.f32 %v3470_v31, %v4287_v9  ;;  %v764_v33 = vpop.f32.mrb[29].mxu0 }
 0x12c   : > { %v765_v34 = vadd.f32 %v4287_v9, %v764_v33  ;;  %3569 = vmatprep.mubr.msk.f32.mxu1 %vm1018_vm1, %v969_v30 }
 0x12d   : > { %v972_v35 = vmax.f32 %v770_v32, 0.0  ;;  %3570 = vmatmul.mubr.msk.f32.gmra.mrb[26].mxu1 %vm1018_vm1, %v970_v29 }
 0x12e   : > { %v971_v36 = vmax.f32 %v765_v34, 0.0  ;;  %v3473_v37 = vpop.f32.mrb[30].mxu0 }
 0x12f   : > { %v780_v38 = vadd.f32 %v3473_v37, %v4287_v9  ;;  %v774_v39 = vpop.f32.mrb[31].mxu0 }
 0x130   : > { %v775_v40 = vadd.f32 %v4287_v9, %v774_v39  ;;  %3572 = vmatprep.mubr.msk.f32.mxu1 %vm1018_vm1, %v971_v36 }
 0x131   : > { %v974_v41 = vmax.f32 %v780_v38, 0.0  ;;  %3573 = vmatmul.mubr.msk.f32.gmra.mrb[28].mxu1 %vm1018_vm1, %v972_v35 }
 0x132   : > { %v973_v42 = vmax.f32 %v775_v40, 0.0  ;;  %v3476_v43 = vpop.f32.mrb[32].mxu0 }
 0x133   : > { %v790_v44 = vadd.f32 %v3476_v43, %v4287_v9  ;;  %v784_v45 = vpop.f32.mrb[33].mxu0 }
 0x134   : > { %v785_v46 = vadd.f32 %v4287_v9, %v784_v45  ;;  %3575 = vmatprep.mubr.msk.f32.mxu1 %vm1018_vm1, %v973_v42 }
 0x135   : > { %v976_v47 = vmax.f32 %v790_v44, 0.0  ;;  %3576 = vmatmul.mubr.msk.f32.gmra.mrb[30].mxu1 %vm1018_vm1, %v974_v41 }
 0x136   : > { %v975_v48 = vmax.f32 %v785_v46, 0.0  ;;  %v3479_v49 = vpop.f32.mrb[34].mxu0 }
 0x137   : > { %v800_v50 = vadd.f32 %v3479_v49, %v4287_v9  ;;  %v794_v51 = vpop.f32.mrb[35].mxu0 }
 0x138   : > { %v795_v52 = vadd.f32 %v4287_v9, %v794_v51  ;;  %3578 = vmatprep.mubr.msk.f32.mxu1 %vm1018_vm1, %v975_v48 }
 0x139   : > { %v978_v53 = vmax.f32 %v800_v50, 0.0  ;;  %3579 = vmatmul.mubr.msk.f32.gmra.mrb[32].mxu1 %vm1018_vm1, %v976_v47 }
 0x13a   : > { %v977_v54 = vmax.f32 %v795_v52, 0.0  ;;  %v3482_v55 = vpop.f32.mrb[36].mxu0 }
 0x13b   : > { %v810_v56 = vadd.f32 %v3482_v55, %v4287_v9  ;;  %v804_v57 = vpop.f32.mrb[37].mxu0 }
 0x13c   : > { %v805_v58 = vadd.f32 %v4287_v9, %v804_v57  ;;  %3581 = vmatprep.mubr.msk.f32.mxu1 %vm1018_vm1, %v977_v54 }
 0x13d   : > { %v980_v59 = vmax.f32 %v810_v56, 0.0  ;;  %3582 = vmatmul.mubr.msk.f32.gmra.mrb[34].mxu1 %vm1018_vm1, %v978_v53 }
 0x13e   : > { %v979_v60 = vmax.f32 %v805_v58, 0.0  ;;  %v3485_v61 = vpop.f32.mrb[38].mxu0 }
 0x13f   : > { %v820_v62 = vadd.f32 %v3485_v61, %v4287_v9  ;;  %v814_v63 = vpop.f32.mrb[39].mxu0 }
 0x140   : > { %v815_v0 = vadd.f32 %v4287_v9, %v814_v63  ;;  %3584 = vmatprep.mubr.msk.f32.mxu1 %vm1018_vm1, %v979_v60 }
 0x141   : > { %v982_v1 = vmax.f32 %v820_v62, 0.0  ;;  %3585 = vmatmul.mubr.msk.f32.gmra.mrb[36].mxu1 %vm1018_vm1, %v980_v59 }
 0x142   : > { %v981_v2 = vmax.f32 %v815_v0, 0.0  ;;  %v3488_v3 = vpop.f32.mrb[40].mxu0 }
 0x143   : > { %v830_v4 = vadd.f32 %v3488_v3, %v4287_v9  ;;  %v824_v5 = vpop.f32.mrb[41].mxu0 }
 0x144   : > { %v825_v6 = vadd.f32 %v4287_v9, %v824_v5  ;;  %3587 = vmatprep.mubr.msk.f32.mxu1 %vm1018_vm1, %v981_v2 }
 0x145   : > { %v984_v7 = vmax.f32 %v830_v4, 0.0  ;;  %3588 = vmatmul.mubr.msk.f32.gmra.mrb[38].mxu1 %vm1018_vm1, %v982_v1 }
 0x146   : > { %v983_v8 = vmax.f32 %v825_v6, 0.0  ;;  %v3491_v10 = vpop.f32.mrb[42].mxu0 }
 0x147   : > { %v840_v11 = vadd.f32 %v3491_v10, %v4287_v9  ;;  %v834_v12 = vpop.f32.mrb[43].mxu0 }
 0x148   : > { %v835_v13 = vadd.f32 %v4287_v9, %v834_v12  ;;  %3590 = vmatprep.mubr.msk.f32.mxu1 %vm1018_vm1, %v983_v8 }
 0x149   : > { %v986_v14 = vmax.f32 %v840_v11, 0.0  ;;  %3591 = vmatmul.mubr.msk.f32.gmra.mrb[40].mxu1 %vm1018_vm1, %v984_v7 }
 0x14a   : > { %v985_v15 = vmax.f32 %v835_v13, 0.0  ;;  %v3494_v16 = vpop.f32.mrb[44].mxu0  ;;  %v4423_v13 = vld [vmem:[%s5067_s4] ss:$0 sm:$0xff] }
 0x14b   : > { %v850_v17 = vadd.f32 %v3494_v16, %v4287_v9  ;;  %v844_v18 = vpop.f32.mrb[45].mxu0 }
 0x14c   : > { %v845_v19 = vadd.f32 %v4287_v9, %v844_v18  ;;  %3593 = vmatprep.mubr.msk.f32.mxu1 %vm1018_vm1, %v985_v15 }
 0x14d   : > { %v988_v20 = vmax.f32 %v850_v17, 0.0  ;;  %3594 = vmatmul.mubr.msk.f32.gmra.mrb[42].mxu1 %vm1018_vm1, %v986_v14 }
 0x14e   : > { %v987_v21 = vmax.f32 %v845_v19, 0.0  ;;  %v3497_v22 = vpop.f32.mrb[46].mxu0 }
 0x14f   : > { %v860_v23 = vadd.f32 %v3497_v22, %v4287_v9  ;;  %v854_v24 = vpop.f32.mrb[47].mxu0 }
 0x150   : > { %v855_v25 = vadd.f32 %v4287_v9, %v854_v24  ;;  %3596 = vmatprep.mubr.msk.f32.mxu1 %vm1018_vm1, %v987_v21 }
 0x151   : > { %v990_v26 = vmax.f32 %v860_v23, 0.0  ;;  %3597 = vmatmul.mubr.msk.f32.gmra.mrb[44].mxu1 %vm1018_vm1, %v988_v20 }
 0x152   : > { %v989_v27 = vmax.f32 %v855_v25, 0.0  ;;  %v3500_v28 = vpop.f32.mrb[48].mxu0 }
 0x153   : > { %v870_v29 = vadd.f32 %v3500_v28, %v4287_v9  ;;  %v864_v30 = vpop.f32.mrb[49].mxu0 }
 0x154   : > { %v865_v31 = vadd.f32 %v4287_v9, %v864_v30  ;;  %3599 = vmatprep.mubr.msk.f32.mxu1 %vm1018_vm1, %v989_v27 }
 0x155   : > { %v992_v32 = vmax.f32 %v870_v29, 0.0  ;;  %3600 = vmatmul.mubr.msk.f32.gmra.mrb[46].mxu1 %vm1018_vm1, %v990_v26 }
 0x156   : > { %v991_v33 = vmax.f32 %v865_v31, 0.0  ;;  %v3503_v34 = vpop.f32.mrb[50].mxu0 }
 0x157   : > { %v880_v35 = vadd.f32 %v3503_v34, %v4287_v9  ;;  %v874_v36 = vpop.f32.mrb[51].mxu0 }
 0x158   : > { %v875_v37 = vadd.f32 %v4287_v9, %v874_v36  ;;  %3602 = vmatprep.mubr.msk.f32.mxu1 %vm1018_vm1, %v991_v33 }
 0x159   : > { %v994_v38 = vmax.f32 %v880_v35, 0.0  ;;  %3603 = vmatmul.mubr.msk.f32.gmra.mrb[48].mxu1 %vm1018_vm1, %v992_v32 }
 0x15a   : > { %v993_v39 = vmax.f32 %v875_v37, 0.0  ;;  %v3506_v40 = vpop.f32.mrb[52].mxu0 }
 0x15b   : > { %v890_v41 = vadd.f32 %v3506_v40, %v4287_v9  ;;  %v884_v42 = vpop.f32.mrb[53].mxu0 }
 0x15c   : > { %v885_v43 = vadd.f32 %v4287_v9, %v884_v42  ;;  %3605 = vmatprep.mubr.msk.f32.mxu1 %vm1018_vm1, %v993_v39 }
 0x15d   : > { %v996_v44 = vmax.f32 %v890_v41, 0.0  ;;  %3606 = vmatmul.mubr.msk.f32.gmra.mrb[50].mxu1 %vm1018_vm1, %v994_v38 }
 0x15e   : > { %v995_v45 = vmax.f32 %v885_v43, 0.0  ;;  %v3509_v46 = vpop.f32.mrb[54].mxu0 }
 0x15f   : > { %v900_v47 = vadd.f32 %v3509_v46, %v4287_v9  ;;  %v894_v48 = vpop.f32.mrb[55].mxu0 }
 0x160   : > { %v895_v49 = vadd.f32 %v4287_v9, %v894_v48  ;;  %3608 = vmatprep.mubr.msk.f32.mxu1 %vm1018_vm1, %v995_v45 }
 0x161   : > { %v998_v50 = vmax.f32 %v900_v47, 0.0  ;;  %3609 = vmatmul.mubr.msk.f32.gmra.mrb[52].mxu1 %vm1018_vm1, %v996_v44 }
 0x162   : > { %v997_v51 = vmax.f32 %v895_v49, 0.0  ;;  %v3512_v52 = vpop.f32.mrb[56].mxu0 }
 0x163   : > { %v910_v53 = vadd.f32 %v3512_v52, %v4287_v9  ;;  %v904_v54 = vpop.f32.mrb[57].mxu0 }
 0x164   : > { %v905_v55 = vadd.f32 %v4287_v9, %v904_v54  ;;  %3611 = vmatprep.mubr.msk.f32.mxu1 %vm1018_vm1, %v997_v51 }
 0x165   : > { %v1000_v56 = vmax.f32 %v910_v53, 0.0  ;;  %3612 = vmatmul.mubr.msk.f32.gmra.mrb[54].mxu1 %vm1018_vm1, %v998_v50 }
 0x166   : > { %v999_v57 = vmax.f32 %v905_v55, 0.0  ;;  %v3515_v58 = vpop.f32.mrb[58].mxu0 }
 0x167   : > { %v920_v59 = vadd.f32 %v3515_v58, %v4287_v9  ;;  %v914_v60 = vpop.f32.mrb[59].mxu0 }
 0x168   : > { %v915_v61 = vadd.f32 %v4287_v9, %v914_v60  ;;  %3614 = vmatprep.mubr.msk.f32.mxu1 %vm1018_vm1, %v999_v57 }
 0x169   : > { %v1002_v62 = vmax.f32 %v920_v59, 0.0  ;;  %3615 = vmatmul.mubr.msk.f32.gmra.mrb[56].mxu1 %vm1018_vm1, %v1000_v56 }
 0x16a   : > { %v1001_v63 = vmax.f32 %v915_v61, 0.0  ;;  %v3518_v0 = vpop.f32.mrb[60].mxu0 }
 0x16b   : > { %v930_v1 = vadd.f32 %v3518_v0, %v4287_v9  ;;  %v924_v2 = vpop.f32.mrb[61].mxu0 }
 0x16c   : > { %v925_v3 = vadd.f32 %v4287_v9, %v924_v2  ;;  %3617 = vmatprep.mubr.msk.f32.mxu1 %vm1018_vm1, %v1001_v63 }
 0x16d   : > { %v1004_v4 = vmax.f32 %v930_v1, 0.0  ;;  %3618 = vmatmul.mubr.msk.f32.gmra.mrb[58].mxu1 %vm1018_vm1, %v1002_v62 }
 0x16e   : > { %v1003_v5 = vmax.f32 %v925_v3, 0.0  ;;  %v3521_v6 = vpop.f32.mrb[62].mxu0 }
 0x16f   : > { %v940_v7 = vadd.f32 %v3521_v6, %v4287_v9  ;;  %v934_v8 = vpop.f32.mrb[63].mxu0 }
 0x170   : > { %v935_v10 = vadd.f32 %v4287_v9, %v934_v8  ;;  %3620 = vmatprep.mubr.msk.f32.mxu1 %vm1018_vm1, %v1003_v5  ;;  %v4429_v9 = vld [vmem:[%s5068_s5] ss:$0 sm:$0xff] }
 0x171   : > { %v1006_v11 = vmax.f32 %v940_v7, 0.0  ;;  %3621 = vmatmul.mubr.msk.f32.gmra.mrb[60].mxu1 %vm1018_vm1, %v1004_v4 }
 0x172   : > { %v1005_v12 = vmax.f32 %v935_v10, 0.0 }
 0x174   : > { %3623 = vmatprep.mubr.msk.f32.mxu1 %vm1018_vm1, %v1005_v12 }
 0x175   : > { %3624 = vmatmul.mubr.msk.f32.gmra.mrb[62].mxu1 %vm1018_vm1, %v1006_v11 }
 0x1cc   : > { %v3532_v14 = vpop.f32.mrb[0].mxu1 }
 0x1cd   : > { %v4432_v15 = vadd.f32 %v3532_v14, %v4423_v13  ;;  %v1277_v16 = vpop.f32.mrb[1].mxu1 }
 0x1ce   : > { %v4435_v17 = vadd.f32 %v4423_v13, %v1277_v16 }
 0x1cf   : > { %v1604_v18 = vmul.f32 %v4429_v9, %v4432_v15 }
 0x1d0   : > { %v3100_v19 = vpack.c.bf16 %v4432_v15, %v4435_v17  ;;  %v3535_v20 = vpop.f32.mrb[2].mxu1  ;;  %v1603_v25 = vmul.f32 %v4429_v9, %v4435_v17 }
 0x1d1   : > { %v4442_v21 = vadd.f32 %v3535_v20, %v4423_v13  ;;  %1669 = vadd.xlane.f32.xlu0 %v1604_v18  ;;  %v1287_v22 = vpop.f32.mrb[3].mxu1 }
 0x1d2   : > { %3101 = vst [vmem:[%s4444_s29] sm:$0xff] %v3100_v19   ;;  %v4448_v23 = vadd.f32 %v4423_v13, %v1287_v22 }
 0x1d3   : > { %v1606_v24 = vmul.f32 %v4429_v9, %v4442_v21 }
 0x1d4   : > { %v3105_v26 = vpack.c.bf16 %v4442_v21, %v4448_v23  ;;  %v3538_v27 = vpop.f32.mrb[4].mxu1  ;;  %v1605_v31 = vmul.f32 %v4429_v9, %v4448_v23 }
 0x1d5   : > { %v4457_v28 = vadd.f32 %v3538_v27, %v4423_v13  ;;  %1673 = vadd.xlane.f32.xlu1 %v1606_v24  ;;  %v1297_v29 = vpop.f32.mrb[5].mxu1  ;;  %1667 = vadd.xlane.f32.xlu0 %v1603_v25 }
 0x1d6   : > { %3257 = vst [vmem:[%s4444_s29 + $0x8] sm:$0xff] %v3105_v26   ;;  %v4461_v30 = vadd.f32 %v4423_v13, %v1297_v29 }
 0x1d7   : > { %v1608_v38 = vmul.f32 %v4429_v9, %v4457_v28 }
 0x1d8   : > { %v3110_v32 = vpack.c.bf16 %v4457_v28, %v4461_v30  ;;  %v3541_v33 = vpop.f32.mrb[6].mxu1  ;;  %v1607_v34 = vmul.f32 %v4429_v9, %v4461_v30 }
 0x1d9   : > { %v4470_v35 = vadd.f32 %v3541_v33, %v4423_v13  ;;  %v1307_v36 = vpop.f32.mrb[7].mxu1  ;;  %1671 = vadd.xlane.f32.xlu1 %v1605_v31 }
 0x1da   : > { %3258 = vst [vmem:[%s4444_s29 + $0x10] sm:$0xff] %v3110_v32   ;;  %v4474_v37 = vadd.f32 %v4423_v13, %v1307_v36  ;;  %1675 = vadd.xlane.f32.xlu0 %v1607_v34 }
 0x1db   : > { %v1610_v45 = vmul.f32 %v4429_v9, %v4470_v35 }
 0x1dc   : > { %v3115_v39 = vpack.c.bf16 %v4470_v35, %v4474_v37  ;;  %v3544_v40 = vpop.f32.mrb[8].mxu1  ;;  %v1609_v41 = vmul.f32 %v4429_v9, %v4474_v37 }
 0x1dd   : > { %v4483_v42 = vadd.f32 %v3544_v40, %v4423_v13  ;;  %v1317_v43 = vpop.f32.mrb[9].mxu1  ;;  %1677 = vadd.xlane.f32.xlu1 %v1608_v38 }
 0x1de   : > { %3259 = vst [vmem:[%s4444_s29 + $0x18] sm:$0xff] %v3115_v39   ;;  %v4487_v44 = vadd.f32 %v4423_v13, %v1317_v43  ;;  %1679 = vadd.xlane.f32.xlu0 %v1609_v41 }
 0x1df   : > { %v1612_v52 = vmul.f32 %v4429_v9, %v4483_v42 }
 0x1e0   : > { %v3120_v46 = vpack.c.bf16 %v4483_v42, %v4487_v44  ;;  %v3547_v47 = vpop.f32.mrb[10].mxu1  ;;  %v1611_v48 = vmul.f32 %v4429_v9, %v4487_v44 }
 0x1e1   : > { %v4496_v49 = vadd.f32 %v3547_v47, %v4423_v13  ;;  %v1327_v50 = vpop.f32.mrb[11].mxu1  ;;  %1681 = vadd.xlane.f32.xlu1 %v1610_v45 }
 0x1e2   : > { %3260 = vst [vmem:[%s4444_s29 + $0x20] sm:$0xff] %v3120_v46   ;;  %v4500_v51 = vadd.f32 %v4423_v13, %v1327_v50  ;;  %1683 = vadd.xlane.f32.xlu0 %v1611_v48 }
 0x1e3   : > { %v1614_v59 = vmul.f32 %v4429_v9, %v4496_v49 }
 0x1e4   : > { %v3125_v53 = vpack.c.bf16 %v4496_v49, %v4500_v51  ;;  %v3550_v54 = vpop.f32.mrb[12].mxu1  ;;  %v1613_v55 = vmul.f32 %v4429_v9, %v4500_v51 }
 0x1e5   : > { %v4509_v56 = vadd.f32 %v3550_v54, %v4423_v13  ;;  %v1337_v57 = vpop.f32.mrb[13].mxu1  ;;  %1685 = vadd.xlane.f32.xlu1 %v1612_v52 }
 0x1e6   : > { %3261 = vst [vmem:[%s4444_s29 + $0x28] sm:$0xff] %v3125_v53   ;;  %v4513_v58 = vadd.f32 %v4423_v13, %v1337_v57  ;;  %1687 = vadd.xlane.f32.xlu0 %v1613_v55 }
 0x1e7   : > { %v1616_v2 = vmul.f32 %v4429_v9, %v4509_v56 }
 0x1e8   : > { %v3130_v60 = vpack.c.bf16 %v4509_v56, %v4513_v58  ;;  %v3553_v61 = vpop.f32.mrb[14].mxu1  ;;  %v1615_v62 = vmul.f32 %v4429_v9, %v4513_v58 }
 0x1e9   : > { %v4522_v63 = vadd.f32 %v3553_v61, %v4423_v13  ;;  %v1347_v0 = vpop.f32.mrb[15].mxu1  ;;  %1689 = vadd.xlane.f32.xlu1 %v1614_v59 }
 0x1ea   : > { %3262 = vst [vmem:[%s4444_s29 + $0x30] sm:$0xff] %v3130_v60   ;;  %v4526_v1 = vadd.f32 %v4423_v13, %v1347_v0  ;;  %1691 = vadd.xlane.f32.xlu0 %v1615_v62 }
 0x1eb   : > { %v1618_v10 = vmul.f32 %v4429_v9, %v4522_v63 }
 0x1ec   : > { %v3135_v3 = vpack.c.bf16 %v4522_v63, %v4526_v1  ;;  %v3556_v4 = vpop.f32.mrb[16].mxu1  ;;  %v1617_v5 = vmul.f32 %v4429_v9, %v4526_v1 }
 0x1ed   : > { %v4535_v6 = vadd.f32 %v3556_v4, %v4423_v13  ;;  %v1357_v7 = vpop.f32.mrb[17].mxu1  ;;  %1693 = vadd.xlane.f32.xlu1 %v1616_v2 }
 0x1ee   : > { %3263 = vst [vmem:[%s4444_s29 + $0x38] sm:$0xff] %v3135_v3   ;;  %v4539_v8 = vadd.f32 %v4423_v13, %v1357_v7  ;;  %1695 = vadd.xlane.f32.xlu0 %v1617_v5 }
 0x1ef   : > { %v1620_v20 = vmul.f32 %v4429_v9, %v4535_v6 }
 0x1f0   : > { %v3140_v11 = vpack.c.bf16 %v4535_v6, %v4539_v8  ;;  %v3559_v12 = vpop.f32.mrb[18].mxu1  ;;  %v1619_v14 = vmul.f32 %v4429_v9, %v4539_v8 }
 0x1f1   : > { %v4548_v16 = vadd.f32 %v3559_v12, %v4423_v13  ;;  %v1367_v18 = vpop.f32.mrb[19].mxu1  ;;  %1697 = vadd.xlane.f32.xlu1 %v1618_v10 }
 0x1f2   : > { %3264 = vst [vmem:[%s4444_s29 + $0x40] sm:$0xff] %v3140_v11   ;;  %v4552_v19 = vadd.f32 %v4423_v13, %v1367_v18  ;;  %1699 = vadd.xlane.f32.xlu0 %v1619_v14 }
 0x1f3   : > { %v1622_v31 = vmul.f32 %v4429_v9, %v4548_v16 }
 0x1f4   : > { %v3145_v22 = vpack.c.bf16 %v4548_v16, %v4552_v19  ;;  %v3562_v24 = vpop.f32.mrb[20].mxu1  ;;  %v1621_v25 = vmul.f32 %v4429_v9, %v4552_v19 }
 0x1f5   : > { %v4561_v26 = vadd.f32 %v3562_v24, %v4423_v13  ;;  %v1377_v27 = vpop.f32.mrb[21].mxu1  ;;  %1701 = vadd.xlane.f32.xlu1 %v1620_v20 }
 0x1f6   : > { %3265 = vst [vmem:[%s4444_s29 + $0x48] sm:$0xff] %v3145_v22   ;;  %v4565_v29 = vadd.f32 %v4423_v13, %v1377_v27  ;;  %1703 = vadd.xlane.f32.xlu0 %v1621_v25 }
 0x1f7   : > { %v1624_v40 = vmul.f32 %v4429_v9, %v4561_v26 }
 0x1f8   : > { %v3150_v32 = vpack.c.bf16 %v4561_v26, %v4565_v29  ;;  %v3565_v33 = vpop.f32.mrb[22].mxu1  ;;  %v1623_v34 = vmul.f32 %v4429_v9, %v4565_v29 }
 0x1f9   : > { %v4574_v36 = vadd.f32 %v3565_v33, %v4423_v13  ;;  %v1387_v38 = vpop.f32.mrb[23].mxu1  ;;  %1705 = vadd.xlane.f32.xlu1 %v1622_v31 }
 0x1fa   : > { %3266 = vst [vmem:[%s4444_s29 + $0x50] sm:$0xff] %v3150_v32   ;;  %v4578_v39 = vadd.f32 %v4423_v13, %v1387_v38  ;;  %1707 = vadd.xlane.f32.xlu0 %v1623_v34 }
 0x1fb   : > { %v1626_v50 = vmul.f32 %v4429_v9, %v4574_v36 }
 0x1fc   : > { %v3155_v41 = vpack.c.bf16 %v4574_v36, %v4578_v39  ;;  %v3568_v43 = vpop.f32.mrb[24].mxu1  ;;  %v1625_v45 = vmul.f32 %v4429_v9, %v4578_v39 }
 0x1fd   : > { %v4587_v46 = vadd.f32 %v3568_v43, %v4423_v13  ;;  %v1397_v47 = vpop.f32.mrb[25].mxu1  ;;  %1709 = vadd.xlane.f32.xlu1 %v1624_v40 }
 0x1fe   : > { %3267 = vst [vmem:[%s4444_s29 + $0x58] sm:$0xff] %v3155_v41   ;;  %v4591_v48 = vadd.f32 %v4423_v13, %v1397_v47  ;;  %1711 = vadd.xlane.f32.xlu0 %v1625_v45 }
 0x1ff   : > { %v1628_v60 = vmul.f32 %v4429_v9, %v4587_v46 }
 0x200   : > { %v3160_v52 = vpack.c.bf16 %v4587_v46, %v4591_v48  ;;  %v3571_v53 = vpop.f32.mrb[26].mxu1  ;;  %v1627_v54 = vmul.f32 %v4429_v9, %v4591_v48 }
 0x201   : > { %v4600_v55 = vadd.f32 %v3571_v53, %v4423_v13  ;;  %v1407_v57 = vpop.f32.mrb[27].mxu1  ;;  %1713 = vadd.xlane.f32.xlu1 %v1626_v50 }
 0x202   : > { %3268 = vst [vmem:[%s4444_s29 + $0x60] sm:$0xff] %v3160_v52   ;;  %v4604_v59 = vadd.f32 %v4423_v13, %v1407_v57  ;;  %1715 = vadd.xlane.f32.xlu0 %v1627_v54 }
 0x203   : > { %v1630_v5 = vmul.f32 %v4429_v9, %v4600_v55 }
 0x204   : > { %v3165_v61 = vpack.c.bf16 %v4600_v55, %v4604_v59  ;;  %v3574_v62 = vpop.f32.mrb[28].mxu1  ;;  %v1629_v0 = vmul.f32 %v4429_v9, %v4604_v59 }
 0x205   : > { %v4613_v2 = vadd.f32 %v3574_v62, %v4423_v13  ;;  %v1417_v3 = vpop.f32.mrb[29].mxu1  ;;  %1717 = vadd.xlane.f32.xlu1 %v1628_v60 }
 0x206   : > { %3269 = vst [vmem:[%s4444_s29 + $0x68] sm:$0xff] %v3165_v61   ;;  %v4617_v4 = vadd.f32 %v4423_v13, %v1417_v3  ;;  %1719 = vadd.xlane.f32.xlu0 %v1629_v0 }
 0x207   : > { %v1632_v20 = vmul.f32 %v4429_v9, %v4613_v2 }
 0x208   : > { %v3170_v7 = vpack.c.bf16 %v4613_v2, %v4617_v4  ;;  %v3577_v10 = vpop.f32.mrb[30].mxu1  ;;  %v1631_v11 = vmul.f32 %v4429_v9, %v4617_v4 }
 0x209   : > { %v4626_v12 = vadd.f32 %v3577_v10, %v4423_v13  ;;  %v1427_v14 = vpop.f32.mrb[31].mxu1  ;;  %1721 = vadd.xlane.f32.xlu1 %v1630_v5 }
 0x20a   : > { %3270 = vst [vmem:[%s4444_s29 + $0x70] sm:$0xff] %v3170_v7   ;;  %v4630_v18 = vadd.f32 %v4423_v13, %v1427_v14  ;;  %1723 = vadd.xlane.f32.xlu0 %v1631_v11 }
 0x20b   : > { %v1634_v33 = vmul.f32 %v4429_v9, %v4626_v12 }
 0x20c   : > { %v3175_v22 = vpack.c.bf16 %v4626_v12, %v4630_v18  ;;  %v3580_v24 = vpop.f32.mrb[32].mxu1  ;;  %v1633_v25 = vmul.f32 %v4429_v9, %v4630_v18 }
 0x20d   : > { %v4639_v27 = vadd.f32 %v3580_v24, %v4423_v13  ;;  %v1437_v31 = vpop.f32.mrb[33].mxu1  ;;  %1725 = vadd.xlane.f32.xlu1 %v1632_v20 }
 0x20e   : > { %3271 = vst [vmem:[%s4444_s29 + $0x78] sm:$0xff] %v3175_v22   ;;  %v4643_v32 = vadd.f32 %v4423_v13, %v1437_v31  ;;  %1727 = vadd.xlane.f32.xlu0 %v1633_v25 }
 0x20f   : > { %v1636_v47 = vmul.f32 %v4429_v9, %v4639_v27 }
 0x210   : > { %v3180_v34 = vpack.c.bf16 %v4639_v27, %v4643_v32  ;;  %v3583_v38 = vpop.f32.mrb[34].mxu1  ;;  %v1635_v40 = vmul.f32 %v4429_v9, %v4643_v32 }
 0x211   : > { %v4652_v41 = vadd.f32 %v3583_v38, %v4423_v13  ;;  %v1447_v43 = vpop.f32.mrb[35].mxu1  ;;  %1729 = vadd.xlane.f32.xlu1 %v1634_v33 }
 0x212   : > { %3272 = vst [vmem:[%s4444_s29 + $0x80] sm:$0xff] %v3180_v34   ;;  %v4656_v45 = vadd.f32 %v4423_v13, %v1447_v43  ;;  %1731 = vadd.xlane.f32.xlu0 %v1635_v40 }
 0x213   : > { %v1638_v61 = vmul.f32 %v4429_v9, %v4652_v41 }
 0x214   : > { %v3185_v50 = vpack.c.bf16 %v4652_v41, %v4656_v45  ;;  %v3586_v52 = vpop.f32.mrb[36].mxu1  ;;  %v1637_v53 = vmul.f32 %v4429_v9, %v4656_v45 }
 0x215   : > { %v4665_v54 = vadd.f32 %v3586_v52, %v4423_v13  ;;  %v1457_v57 = vpop.f32.mrb[37].mxu1  ;;  %1733 = vadd.xlane.f32.xlu1 %v1636_v47 }
 0x216   : > { %3273 = vst [vmem:[%s4444_s29 + $0x88] sm:$0xff] %v3185_v50   ;;  %v4669_v60 = vadd.f32 %v4423_v13, %v1457_v57  ;;  %1735 = vadd.xlane.f32.xlu0 %v1637_v53 }
 0x217   : > { %v1640_v11 = vmul.f32 %v4429_v9, %v4665_v54 }
 0x218   : > { %v3190_v62 = vpack.c.bf16 %v4665_v54, %v4669_v60  ;;  %v3589_v0 = vpop.f32.mrb[38].mxu1  ;;  %v1639_v3 = vmul.f32 %v4429_v9, %v4669_v60 }
 0x219   : > { %v4678_v5 = vadd.f32 %v3589_v0, %v4423_v13  ;;  %v1467_v7 = vpop.f32.mrb[39].mxu1  ;;  %1737 = vadd.xlane.f32.xlu1 %v1638_v61 }
 0x21a   : > { %3274 = vst [vmem:[%s4444_s29 + $0x90] sm:$0xff] %v3190_v62   ;;  %v4682_v10 = vadd.f32 %v4423_v13, %v1467_v7  ;;  %1739 = vadd.xlane.f32.xlu0 %v1639_v3 }
 0x21b   : > { %v1642_v33 = vmul.f32 %v4429_v9, %v4678_v5 }
 0x21c   : > { %v3195_v14 = vpack.c.bf16 %v4678_v5, %v4682_v10  ;;  %v3592_v20 = vpop.f32.mrb[40].mxu1  ;;  %v1641_v22 = vmul.f32 %v4429_v9, %v4682_v10 }
 0x21d   : > { %v4691_v24 = vadd.f32 %v3592_v20, %v4423_v13  ;;  %v1477_v25 = vpop.f32.mrb[41].mxu1  ;;  %1741 = vadd.xlane.f32.xlu1 %v1640_v11 }
 0x21e   : > { %3275 = vst [vmem:[%s4444_s29 + $0x98] sm:$0xff] %v3195_v14   ;;  %v4695_v31 = vadd.f32 %v4423_v13, %v1477_v25  ;;  %1743 = vadd.xlane.f32.xlu0 %v1641_v22 }
 0x21f   : > { %v1644_v52 = vmul.f32 %v4429_v9, %v4691_v24 }
 0x220   : > { %v3200_v34 = vpack.c.bf16 %v4691_v24, %v4695_v31  ;;  %v3595_v38 = vpop.f32.mrb[42].mxu1  ;;  %v1643_v40 = vmul.f32 %v4429_v9, %v4695_v31 }
 0x221   : > { %v4704_v43 = vadd.f32 %v3595_v38, %v4423_v13  ;;  %v1487_v47 = vpop.f32.mrb[43].mxu1  ;;  %1745 = vadd.xlane.f32.xlu1 %v1642_v33 }
 0x222   : > { %3276 = vst [vmem:[%s4444_s29 + $0xa0] sm:$0xff] %v3200_v34   ;;  %v4708_v50 = vadd.f32 %v4423_v13, %v1487_v47  ;;  %1747 = vadd.xlane.f32.xlu0 %v1643_v40 }
 0x223   : > { %v1646_v7 = vmul.f32 %v4429_v9, %v4704_v43 }
 0x224   : > { %v3205_v53 = vpack.c.bf16 %v4704_v43, %v4708_v50  ;;  %v3598_v57 = vpop.f32.mrb[44].mxu1  ;;  %v1645_v61 = vmul.f32 %v4429_v9, %v4708_v50 }
 0x225   : > { %v4717_v62 = vadd.f32 %v3598_v57, %v4423_v13  ;;  %v1497_v0 = vpop.f32.mrb[45].mxu1  ;;  %1749 = vadd.xlane.f32.xlu1 %v1644_v52 }
 0x226   : > { %3277 = vst [vmem:[%s4444_s29 + $0xa8] sm:$0xff] %v3205_v53   ;;  %v4721_v3 = vadd.f32 %v4423_v13, %v1497_v0  ;;  %1751 = vadd.xlane.f32.xlu0 %v1645_v61 }
 0x227   : > { %v1648_v34 = vmul.f32 %v4429_v9, %v4717_v62 }
 0x228   : > { %v3210_v11 = vpack.c.bf16 %v4717_v62, %v4721_v3  ;;  %v3601_v14 = vpop.f32.mrb[46].mxu1  ;;  %v1647_v20 = vmul.f32 %v4429_v9, %v4721_v3 }
 0x229   : > { %v4730_v22 = vadd.f32 %v3601_v14, %v4423_v13  ;;  %v1507_v25 = vpop.f32.mrb[47].mxu1  ;;  %1753 = vadd.xlane.f32.xlu1 %v1646_v7 }
 0x22a   : > { %3278 = vst [vmem:[%s4444_s29 + $0xb0] sm:$0xff] %v3210_v11   ;;  %v4734_v33 = vadd.f32 %v4423_v13, %v1507_v25  ;;  %1755 = vadd.xlane.f32.xlu0 %v1647_v20 }
 0x22b   : > { %5090 = vst [vmem:[#allocation8_spill] sm:$0xff] %v4730_v22  ;;  %v1650_v61 = vmul.f32 %v4429_v9, %v4730_v22 }
 0x22c   : > { %v3215_v38 = vpack.c.bf16 %v4730_v22, %v4734_v33  ;;  %v3604_v40 = vpop.f32.mrb[48].mxu1  ;;  %v1649_v47 = vmul.f32 %v4429_v9, %v4734_v33 }
 0x22d   : > { %v4743_v52 = vadd.f32 %v3604_v40, %v4423_v13  ;;  %v1517_v53 = vpop.f32.mrb[49].mxu1  ;;  %1757 = vadd.xlane.f32.xlu1 %v1648_v34 }
 0x22e   : > { %3279 = vst [vmem:[%s4444_s29 + $0xb8] sm:$0xff] %v3215_v38   ;;  %v4747_v57 = vadd.f32 %v4423_v13, %v1517_v53  ;;  %1759 = vadd.xlane.f32.xlu0 %v1649_v47 }
 0x22f   : > { %5091 = vst [vmem:[#allocation9_spill] sm:$0xff] %v4743_v52  ;;  %v1652_v34 = vmul.f32 %v4429_v9, %v4743_v52 }
 0x230   : > { %5092 = vst [vmem:[#allocation10_spill] sm:$0xff] %v4747_v57  ;;  %v3220_v0 = vpack.c.bf16 %v4743_v52, %v4747_v57  ;;  %v3607_v7 = vpop.f32.mrb[50].mxu1  ;;  %v1651_v11 = vmul.f32 %v4429_v9, %v4747_v57 }
 0x231   : > { %v4756_v14 = vadd.f32 %v3607_v7, %v4423_v13  ;;  %v1527_v20 = vpop.f32.mrb[51].mxu1  ;;  %1761 = vadd.xlane.f32.xlu1 %v1650_v61 }
 0x232   : > { %3280 = vst [vmem:[%s4444_s29 + $0xc0] sm:$0xff] %v3220_v0   ;;  %v4760_v25 = vadd.f32 %v4423_v13, %v1527_v20  ;;  %1763 = vadd.xlane.f32.xlu0 %v1651_v11 }
 0x233   : > { %5093 = vst [vmem:[#allocation11_spill] sm:$0xff] %v4756_v14  ;;  %v1654_v7 = vmul.f32 %v4429_v9, %v4756_v14 }
 0x234   : > { %5094 = vst [vmem:[#allocation12_spill] sm:$0xff] %v4760_v25  ;;  %v3225_v38 = vpack.c.bf16 %v4756_v14, %v4760_v25  ;;  %v3610_v40 = vpop.f32.mrb[52].mxu1  ;;  %v1653_v47 = vmul.f32 %v4429_v9, %v4760_v25 }
 0x235   : > { %v4769_v53 = vadd.f32 %v3610_v40, %v4423_v13  ;;  %v1537_v61 = vpop.f32.mrb[53].mxu1  ;;  %1765 = vadd.xlane.f32.xlu1 %v1652_v34 }
 0x236   : > { %3281 = vst [vmem:[%s4444_s29 + $0xc8] sm:$0xff] %v3225_v38   ;;  %v4773_v0 = vadd.f32 %v4423_v13, %v1537_v61  ;;  %1767 = vadd.xlane.f32.xlu0 %v1653_v47 }
 0x237   : > { %5095 = vst [vmem:[#allocation13_spill] sm:$0xff] %v4769_v53  ;;  %v1656_v47 = vmul.f32 %v4429_v9, %v4769_v53 }
 0x238   : > { %5096 = vst [vmem:[#allocation14_spill] sm:$0xff] %v4773_v0  ;;  %v3230_v11 = vpack.c.bf16 %v4769_v53, %v4773_v0  ;;  %v3613_v20 = vpop.f32.mrb[54].mxu1  ;;  %v1655_v25 = vmul.f32 %v4429_v9, %v4773_v0 }
 0x239   : > { %v4782_v40 = vadd.f32 %v3613_v20, %v4423_v13  ;;  %v1547_v34 = vpop.f32.mrb[55].mxu1  ;;  %1769 = vadd.xlane.f32.xlu1 %v1654_v7 }
 0x23a   : > { %3282 = vst [vmem:[%s4444_s29 + $0xd0] sm:$0xff] %v3230_v11   ;;  %v4786_v38 = vadd.f32 %v4423_v13, %v1547_v34  ;;  %1771 = vadd.xlane.f32.xlu0 %v1655_v25 }
 0x23b   : > { %5097 = vst [vmem:[#allocation15_spill] sm:$0xff] %v4782_v40  ;;  %v1658_v25 = vmul.f32 %v4429_v9, %v4782_v40 }
 0x23c   : > { %5098 = vst [vmem:[#allocation16_spill] sm:$0xff] %v4786_v38  ;;  %v3235_v61 = vpack.c.bf16 %v4782_v40, %v4786_v38  ;;  %v3616_v14 = vpop.f32.mrb[56].mxu1  ;;  %v1657_v0 = vmul.f32 %v4429_v9, %v4786_v38 }
 0x23d   : > { %v4795_v20 = vadd.f32 %v3616_v14, %v4423_v13  ;;  %v1557_v7 = vpop.f32.mrb[57].mxu1  ;;  %1773 = vadd.xlane.f32.xlu1 %v1656_v47 }
 0x23e   : > { %3283 = vst [vmem:[%s4444_s29 + $0xd8] sm:$0xff] %v3235_v61   ;;  %v4799_v11 = vadd.f32 %v4423_v13, %v1557_v7  ;;  %1775 = vadd.xlane.f32.xlu0 %v1657_v0 }
 0x23f   : > { %5099 = vst [vmem:[#allocation17_spill] sm:$0xff] %v4795_v20  ;;  %v1660_v0 = vmul.f32 %v4429_v9, %v4795_v20 }
 0x240   : > { %5100 = vst [vmem:[#allocation18_spill] sm:$0xff] %v4799_v11  ;;  %v3240_v34 = vpack.c.bf16 %v4795_v20, %v4799_v11  ;;  %v3619_v53 = vpop.f32.mrb[58].mxu1  ;;  %v1659_v38 = vmul.f32 %v4429_v9, %v4799_v11 }
 0x241   : > { %v4808_v14 = vadd.f32 %v3619_v53, %v4423_v13  ;;  %v1567_v47 = vpop.f32.mrb[59].mxu1  ;;  %1777 = vadd.xlane.f32.xlu1 %v1658_v25 }
 0x242   : > { %3284 = vst [vmem:[%s4444_s29 + $0xe0] sm:$0xff] %v3240_v34   ;;  %v4812_v61 = vadd.f32 %v4423_v13, %v1567_v47  ;;  %1779 = vadd.xlane.f32.xlu0 %v1659_v38 }
 0x243   : > { %5101 = vst [vmem:[#allocation19_spill] sm:$0xff] %v4808_v14  ;;  %v1662_v38 = vmul.f32 %v4429_v9, %v4808_v14 }
 0x244   : > { %5102 = vst [vmem:[#allocation20_spill] sm:$0xff] %v4812_v61  ;;  %v3245_v7 = vpack.c.bf16 %v4808_v14, %v4812_v61  ;;  %v3622_v40 = vpop.f32.mrb[60].mxu1  ;;  %v1661_v11 = vmul.f32 %v4429_v9, %v4812_v61 }
 0x245   : > { %v4821_v53 = vadd.f32 %v3622_v40, %v4423_v13  ;;  %v1577_v25 = vpop.f32.mrb[61].mxu1  ;;  %1781 = vadd.xlane.f32.xlu1 %v1660_v0 }
 0x246   : > { %3285 = vst [vmem:[%s4444_s29 + $0xe8] sm:$0xff] %v3245_v7   ;;  %v4825_v34 = vadd.f32 %v4423_v13, %v1577_v25  ;;  %1783 = vadd.xlane.f32.xlu0 %v1661_v11 }
 0x247   : > { %5103 = vst [vmem:[#allocation21_spill] sm:$0xff] %v4821_v53  ;;  %v1664_v11 = vmul.f32 %v4429_v9, %v4821_v53 }
 0x248   : > { %5104 = vst [vmem:[#allocation22_spill] sm:$0xff] %v4825_v34  ;;  %v3250_v47 = vpack.c.bf16 %v4821_v53, %v4825_v34  ;;  %v3625_v20 = vpop.f32.mrb[62].mxu1  ;;  %v1663_v61 = vmul.f32 %v4429_v9, %v4825_v34 }
 0x249   : > { %v4834_v40 = vadd.f32 %v3625_v20, %v4423_v13  ;;  %v1587_v0 = vpop.f32.mrb[63].mxu1  ;;  %1785 = vadd.xlane.f32.xlu1 %v1662_v38 }
 0x24a   : > { %3286 = vst [vmem:[%s4444_s29 + $0xf0] sm:$0xff] %v3250_v47   ;;  %v4838_v7 = vadd.f32 %v4423_v13, %v1587_v0  ;;  %1787 = vadd.xlane.f32.xlu0 %v1663_v61 }
 0x24b   : > { %5105 = vst [vmem:[#allocation23_spill] sm:$0xff] %v4834_v40  ;;  %v1666_v20 = vmul.f32 %v4429_v9, %v4834_v40 }
 0x24c   : > { %5106 = vst [vmem:[#allocation24_spill] sm:$0xff] %v4838_v7  ;;  %v3255_v25 = vpack.c.bf16 %v4834_v40, %v4838_v7  ;;  %v1665_v14 = vmul.f32 %v4429_v9, %v4838_v7 }
 0x24d   : > { %1789 = vadd.xlane.f32.xlu1 %v1664_v11 }
 0x24e   : > { %3287 = vst [vmem:[%s4444_s29 + $0xf8] sm:$0xff] %v3255_v25   ;;  %1791 = vadd.xlane.f32.xlu0 %v1665_v14 }
 0x251   : > { %1793 = vadd.xlane.f32.xlu1 %v1666_v20 }
 0x25e   : > { %v1670_v38 = vpop.xlane.xlu0 %1669 }
 0x25f   : > { %v2896_v13 = vmul.f32 -1.442695, %v1670_v38 }
 0x261   : > { %3686 = vpow2.f32 %v2896_v13 }
 0x262   : > { %v1674_v61 = vpop.xlane.xlu1 %1673  ;;  %v1668_v47 = vpop.xlane.xlu0 %1667 }
 0x263   : > { %v2898_v0 = vmul.f32 -1.442695, %v1674_v61  ;;  %v2895_v53 = vmul.f32 -1.442695, %v1668_v47 }
 0x265   : > { %3688 = vpow2.f32 %v2898_v0 }
 0x266   : > { %3690 = vpow2.f32 %v2895_v53  ;;  %v1672_v34 = vpop.xlane.xlu1 %1671 }
 0x267   : > { %v2897_v52 = vmul.f32 -1.442695, %v1672_v34  ;;  %v1676_v57 = vpop.xlane.xlu0 %1675 }
 0x268   : > { %v2899_v7 = vmul.f32 -1.442695, %v1676_v57 }
 0x269   : > { %3692 = vpow2.f32 %v2897_v52 }
 0x26a   : > { %3694 = vpow2.f32 %v2899_v7  ;;  %v1678_v14 = vpop.xlane.xlu1 %1677 }
 0x26b   : > { %v3687_v11 = vpop.eup %3686  ;;  %v2900_v25 = vmul.f32 -1.442695, %v1678_v14  ;;  %v1680_v9 = vpop.xlane.xlu0 %1679 }
 0x26c   : > { %v1988_v20 = vadd.f32 1.0, %v3687_v11  ;;  %v2901_v40 = vmul.f32 -1.442695, %v1680_v9 }
 0x26d   : > { %3696 = vpow2.f32 %v2900_v25 }
 0x26e   : > { %3698 = vrcp.f32 %v1988_v20  ;;  %v1682_v38 = vpop.xlane.xlu1 %1681 }
 0x26f   : > { %v3689_v13 = vpop.eup %3688  ;;  %3700 = vpow2.f32 %v2901_v40  ;;  %v2902_v61 = vmul.f32 -1.442695, %v1682_v38  ;;  %v1684_v47 = vpop.xlane.xlu0 %1683 }
 0x270   : > { %v3691_v53 = vpop.eup %3690  ;;  %v1990_v34 = vadd.f32 1.0, %v3689_v13  ;;  %v2903_v0 = vmul.f32 -1.442695, %v1684_v47 }
 0x271   : > { %v1987_v57 = vadd.f32 1.0, %v3691_v53  ;;  %3702 = vpow2.f32 %v2902_v61 }
 0x272   : > { %3704 = vrcp.f32 %v1990_v34  ;;  %v1686_v52 = vpop.xlane.xlu1 %1685 }
 0x273   : > { %v3693_v7 = vpop.eup %3692  ;;  %3706 = vrcp.f32 %v1987_v57  ;;  %v2904_v14 = vmul.f32 -1.442695, %v1686_v52  ;;  %v1688_v11 = vpop.xlane.xlu0 %1687 }
 0x274   : > { %v3695_v9 = vpop.eup %3694  ;;  %v1989_v25 = vadd.f32 1.0, %v3693_v7  ;;  %3708 = vpow2.f32 %v2903_v0  ;;  %v2905_v20 = vmul.f32 -1.442695, %v1688_v11 }
 0x275   : > { %v1991_v40 = vadd.f32 1.0, %v3695_v9  ;;  %3710 = vpow2.f32 %v2904_v14 }
 0x276   : > { %3712 = vrcp.f32 %v1989_v25  ;;  %v1690_v38 = vpop.xlane.xlu1 %1689 }
 0x277   : > { %v3697_v22 = vpop.eup %3696  ;;  %3714 = vrcp.f32 %v1991_v40  ;;  %v2906_v13 = vmul.f32 -1.442695, %v1690_v38  ;;  %v1692_v47 = vpop.xlane.xlu0 %1691 }
 0x278   : > { %v3699_v61 = vpop.eup %3698  ;;  %v1992_v53 = vadd.f32 1.0, %v3697_v22  ;;  %3716 = vpow2.f32 %v2905_v20  ;;  %v2907_v34 = vmul.f32 -1.442695, %v1692_v47 }
 0x279   : > { %v3701_v57 = vpop.eup %3700  ;;  %v2500_v52 = vmul.f32 %v3699_v61, %v4432_v15  ;;  %3718 = vpow2.f32 %v2906_v13 }
 0x27a   : > { %3720 = vrcp.f32 %v1992_v53  ;;  %v1993_v0 = vadd.f32 1.0, %v3701_v57  ;;  %v1694_v7 = vpop.xlane.xlu1 %1693 }
 0x27b   : > { %v3703_v14 = vpop.eup %3702  ;;  %2564 = vst [vmem:[%s4851_s9 + $0x8] sm:$0xff] %v2500_v52  ;;  %3722 = vpow2.f32 %v2907_v34  ;;  %v2908_v11 = vmul.f32 -1.442695, %v1694_v7  ;;  %v1696_v9 = vpop.xlane.xlu0 %1695 }
 0x27c   : > { %v3705_v22 = vpop.eup %3704  ;;  %3724 = vrcp.f32 %v1993_v0  ;;  %v1994_v25 = vadd.f32 1.0, %v3703_v14  ;;  %v2909_v20 = vmul.f32 -1.442695, %v1696_v9 }
 0x27d   : > { %v3707_v15 = vpop.eup %3706  ;;  %v2502_v40 = vmul.f32 %v3705_v22, %v4442_v21  ;;  %3726 = vpow2.f32 %v2908_v11 }
 0x27e   : > { %v3709_v38 = vpop.eup %3708  ;;  %v2499_v13 = vmul.f32 %v3707_v15, %v4435_v17  ;;  %3728 = vrcp.f32 %v1994_v25  ;;  %v1698_v47 = vpop.xlane.xlu1 %1697 }
 0x27f   : > { %v3711_v61 = vpop.eup %3710  ;;  %2566 = vst [vmem:[%s4851_s9 + $0x18] sm:$0xff] %v2502_v40  ;;  %v1995_v21 = vadd.f32 1.0, %v3709_v38  ;;  %3730 = vpow2.f32 %v2909_v20  ;;  %v2910_v53 = vmul.f32 -1.442695, %v1698_v47  ;;  %v1700_v34 = vpop.xlane.xlu0 %1699 }
 0x280   : > { %3955 = shalt.err (!%p3952_p3)
}
 0x281   : > { %s3956_s29 = scalar_lea.hbm %s4860_s17, 4096  ;;  %s3960_s15 = scalar_lea.hbm %s5069_s6, 8192 }
 0x282   : > { %p3957_p4 = scmp.ne.s32.totalorder %s4860_s17, %s3956_s29  ;;  %p3961_p9 = scmp.lt.u32.totalorder %s4860_s17, %s5069_s6 }
 0x283   : > { %p3962_p10 = scmp.lt.u32.totalorder %s3960_s15, %s3956_s29  ;;  %p3964_p12 = scmp.lt.u32.totalorder %s3956_s29, %s4860_s17 }
 0x284   : > { %p3958_p7 = pnand %p3957_p4, %p4122_p5 }
 0x285   : > { %p3963_p11 = por %p3962_p10, %p3961_p9 }
 0x286   : > { %p3959_p8 = pneg %p3958_p7 }
 0x287   : > { %p3965_p13 = por %p3964_p12, %p3963_p11 }
 0x289   : > { %p3966_p0 = pnand %p3965_p13, %p3959_p8 }
 0x28b   : > { %3969 = shalt.err (!%p3966_p0)
}
 0x28c   : > { %s4039_s20 = smov 64   ;;  %s4040_s22 = smov 4   ;;  %v3713_v17 = vpop.eup %3712  ;;  %2563 = vst [vmem:[%s4851_s9] sm:$0xff] %v2499_v13  ;;  %v1996_v57 = vadd.f32 1.0, %v3711_v61  ;;  %v2911_v52 = vmul.f32 -1.442695, %v1700_v34  ;;  %3732 = vrcp.f32 %v1995_v21  ;;  %v1702_v9 = vpop.xlane.xlu1 %1701 }
 0x28d   : > { %3638 = dma.vmem_to_hbm [thread:$0]  (%p4122_p5), %s4862_s14, 4096, %s4860_s17, %s2628_s19, %s4039_s20, %s4039_s20, %s4040_s22   ;;  %v3715_v0 = vpop.eup %3714  ;;  %v2501_v7 = vmul.f32 %v3713_v17, %v4448_v23  ;;  %v2912_v20 = vmul.f32 -1.442695, %v1702_v9  ;;  %v1704_v15 = vpop.xlane.xlu0 %1703 }
 0x28e   : > { %v3717_v14 = vpop.eup %3716  ;;  %v2503_v11 = vmul.f32 %v3715_v0, %v4461_v30  ;;  %3734 = vrcp.f32 %v1996_v57  ;;  %v2913_v47 = vmul.f32 -1.442695, %v1704_v15  ;;  %s3096_s14 = sshll.u32 %s4105_s28, 13  ;;  %s2662_s17 = sshll.u32 %s4851_s9, 4  ;;  %s5017_s17 = int_to_ptr.vmem [resolvable:$true] %s2662_s17 }
 0x28f   : > { %v3719_v22 = vpop.eup %3718  ;;  %2565 = vst [vmem:[%s4851_s9 + $0x10] sm:$0xff] %v2501_v7  ;;  %v1997_v25 = vadd.f32 1.0, %v3717_v14  ;;  %3736 = vpow2.f32 %v2910_v53  ;;  %s5015_s29 = scalar_lea.hbm %s5070_s7, %s3096_s14  ;;  %s2633_s28 = scalar_lea.sflag [#allocation5], %s4418_s18 }
 0x290   : > { %v3721_v40 = vpop.eup %3720  ;;  %2567 = vst [vmem:[%s4851_s9 + $0x20] sm:$0xff] %v2503_v11  ;;  %v1998_v38 = vadd.f32 1.0, %v3719_v22  ;;  %3738 = vpow2.f32 %v2911_v52  ;;  %v1706_v21 = vpop.xlane.xlu1 %1705  ;;  %s3970_s8 = scalar_lea.vmem %s5017_s17, 8192  ;;  %s4041_s13 = smov [#allocation4]  }
 0x291   : > { %v3723_v13 = vpop.eup %3722  ;;  %v2504_v23 = vmul.f32 %v3721_v40, %v4457_v28  ;;  %3740 = vrcp.f32 %v1997_v25  ;;  %v2914_v17 = vmul.f32 -1.442695, %v1706_v21  ;;  %v1708_v57 = vpop.xlane.xlu0 %1707  ;;  %p3971_p1 = scmp.ne.s32.totalorder %s5017_s17, %s3970_s8  ;;  %s3974_s15 = sshll.u32 %s4041_s13, 4  ;;  %s3975_s15 = int_to_ptr.vmem [resolvable:$false] %s3974_s15 }
 0x292   : > { %v3725_v30 = vpop.eup %3724  ;;  %3742 = vrcp.f32 %v1998_v38  ;;  %v1999_v61 = vadd.f32 1.0, %v3723_v13  ;;  %v2915_v14 = vmul.f32 -1.442695, %v1708_v57  ;;  %s3976_s16 = scalar_lea.vmem %s3975_s15, 16384  ;;  %p3977_p4 = scmp.lt.s32.totalorder %s5017_s17, %s3975_s15 }
 0x293   : > { %v3727_v34 = vpop.eup %3726  ;;  %2568 = vst [vmem:[%s4851_s9 + $0x28] sm:$0xff] %v2504_v23  ;;  %v2505_v53 = vmul.f32 %v3725_v30, %v4474_v37  ;;  %3744 = vpow2.f32 %v2912_v20  ;;  %p3972_p2 = pnand %p3971_p1, %p4122_p5  ;;  %p3978_p7 = scmp.lt.s32.totalorder %s3976_s16, %s3970_s8 }
 0x294   : > { %v3729_v0 = vpop.eup %3728  ;;  %3746 = vrcp.f32 %v1999_v61  ;;  %v2000_v52 = vadd.f32 1.0, %v3727_v34  ;;  %v1710_v9 = vpop.xlane.xlu1 %1709 }
 0x295   : > { %v3731_v7 = vpop.eup %3730  ;;  %2569 = vst [vmem:[%s4851_s9 + $0x30] sm:$0xff] %v2505_v53  ;;  %v2506_v28 = vmul.f32 %v3729_v0, %v4470_v35  ;;  %3748 = vpow2.f32 %v2913_v47  ;;  %v2916_v37 = vmul.f32 -1.442695, %v1710_v9  ;;  %v1712_v25 = vpop.xlane.xlu0 %1711  ;;  %p3973_p3 = pneg %p3972_p2  ;;  %p3979_p8 = por %p3978_p7, %p3977_p4 }
 0x296   : > { %3750 = vrcp.f32 %v2000_v52  ;;  %v2001_v11 = vadd.f32 1.0, %v3731_v7  ;;  %v3733_v22 = vpop.eup %3732  ;;  %v2917_v40 = vmul.f32 -1.442695, %v1712_v25 }
 0x297   : > { %2570 = vst [vmem:[%s4851_s9 + $0x38] sm:$0xff] %v2506_v28  ;;  %3752 = vpow2.f32 %v2914_v17  ;;  %v2507_v15 = vmul.f32 %v3733_v22, %v4487_v44  ;;  %p3980_p9 = pnand %p3979_p8, %p3973_p3 }
 0x298   : > { %v3735_v20 = vpop.eup %3734  ;;  %3754 = vrcp.f32 %v2001_v11  ;;  %v1714_v47 = vpop.xlane.xlu1 %1713 }
 0x299   : > { %v3737_v38 = vpop.eup %3736  ;;  %v2508_v35 = vmul.f32 %v3735_v20, %v4483_v42  ;;  %3756 = vpow2.f32 %v2915_v14  ;;  %2571 = vst [vmem:[%s4851_s9 + $0x40] sm:$0xff] %v2507_v15  ;;  %v2918_v21 = vmul.f32 -1.442695, %v1714_v47  ;;  %v1716_v34 = vpop.xlane.xlu0 %1715 }
 0x29a   : > { %v3739_v13 = vpop.eup %3738  ;;  %v2002_v23 = vadd.f32 1.0, %v3737_v38  ;;  %3758 = vpow2.f32 %v2916_v37  ;;  %v2919_v17 = vmul.f32 -1.442695, %v1716_v34 }
 0x29b   : > { %v3741_v30 = vpop.eup %3740  ;;  %2572 = vst [vmem:[%s4851_s9 + $0x48] sm:$0xff] %v2508_v35  ;;  %v2003_v61 = vadd.f32 1.0, %v3739_v13  ;;  %3760 = vpow2.f32 %v2917_v40 }
 0x29c   : > { %v3743_v44 = vpop.eup %3742  ;;  %v2509_v53 = vmul.f32 %v3741_v30, %v4500_v51  ;;  %3762 = vrcp.f32 %v2002_v23  ;;  %v1718_v7 = vpop.xlane.xlu1 %1717 }
 0x29d   : > { %v3745_v42 = vpop.eup %3744  ;;  %v2510_v57 = vmul.f32 %v3743_v44, %v4496_v49  ;;  %3764 = vrcp.f32 %v2003_v61  ;;  %v2920_v11 = vmul.f32 -1.442695, %v1718_v7  ;;  %v1720_v51 = vpop.xlane.xlu0 %1719 }
 0x29e   : > { %v3747_v0 = vpop.eup %3746  ;;  %2573 = vst [vmem:[%s4851_s9 + $0x50] sm:$0xff] %v2509_v53  ;;  %v2004_v52 = vadd.f32 1.0, %v3745_v42  ;;  %3766 = vpow2.f32 %v2918_v21  ;;  %v2921_v37 = vmul.f32 -1.442695, %v1720_v51 }
 0x29f   : > { %v3749_v28 = vpop.eup %3748  ;;  %2574 = vst [vmem:[%s4851_s9 + $0x58] sm:$0xff] %v2510_v57  ;;  %v2511_v14 = vmul.f32 %v3747_v0, %v4513_v58  ;;  %3768 = vpow2.f32 %v2919_v17 }
 0x2a0   : > { %v3751_v9 = vpop.eup %3750  ;;  %3770 = vrcp.f32 %v2004_v52  ;;  %v2005_v22 = vadd.f32 1.0, %v3749_v28  ;;  %v1722_v40 = vpop.xlane.xlu1 %1721 }
 0x2a1   : > { %v3753_v49 = vpop.eup %3752  ;;  %2575 = vst [vmem:[%s4851_s9 + $0x60] sm:$0xff] %v2511_v14  ;;  %v2512_v25 = vmul.f32 %v3751_v9, %v4509_v56  ;;  %3772 = vpow2.f32 %v2920_v11  ;;  %v2922_v35 = vmul.f32 -1.442695, %v1722_v40  ;;  %v1724_v13 = vpop.xlane.xlu0 %1723 }
 0x2a2   : > { %v3755_v20 = vpop.eup %3754  ;;  %3774 = vrcp.f32 %v2005_v22  ;;  %v2006_v15 = vadd.f32 1.0, %v3753_v49  ;;  %v2923_v56 = vmul.f32 -1.442695, %v1724_v13 }
 0x2a3   : > { %v3757_v38 = vpop.eup %3756  ;;  %2576 = vst [vmem:[%s4851_s9 + $0x68] sm:$0xff] %v2512_v25  ;;  %v2513_v58 = vmul.f32 %v3755_v20, %v4526_v1  ;;  %3776 = vpow2.f32 %v2921_v37 }
 0x2a4   : > { %v3759_v23 = vpop.eup %3758  ;;  %3778 = vrcp.f32 %v2006_v15  ;;  %v2007_v47 = vadd.f32 1.0, %v3757_v38  ;;  %v1726_v44 = vpop.xlane.xlu1 %1725 }
 0x2a5   : > { %v3761_v30 = vpop.eup %3760  ;;  %2577 = vst [vmem:[%s4851_s9 + $0x70] sm:$0xff] %v2513_v58  ;;  %v2008_v61 = vadd.f32 1.0, %v3759_v23  ;;  %3780 = vpow2.f32 %v2922_v35  ;;  %v2924_v17 = vmul.f32 -1.442695, %v1726_v44  ;;  %v1728_v42 = vpop.xlane.xlu0 %1727 }
 0x2a6   : > { %v3763_v21 = vpop.eup %3762  ;;  %3782 = vrcp.f32 %v2007_v47  ;;  %v2009_v34 = vadd.f32 1.0, %v3761_v30  ;;  %v2925_v28 = vmul.f32 -1.442695, %v1728_v42 }
 0x2a7   : > { %v3765_v53 = vpop.eup %3764  ;;  %v2514_v1 = vmul.f32 %v3763_v21, %v4522_v63  ;;  %3784 = vrcp.f32 %v2008_v61 }
 0x2a8   : > { %v3767_v57 = vpop.eup %3766  ;;  %v2515_v0 = vmul.f32 %v3765_v53, %v4539_v8  ;;  %3786 = vrcp.f32 %v2009_v34  ;;  %v1730_v51 = vpop.xlane.xlu1 %1729 }
 0x2a9   : > { %v3769_v52 = vpop.eup %3768  ;;  %2578 = vst [vmem:[%s4851_s9 + $0x78] sm:$0xff] %v2514_v1  ;;  %v2010_v7 = vadd.f32 1.0, %v3767_v57  ;;  %3788 = vpow2.f32 %v2923_v56  ;;  %v2926_v22 = vmul.f32 -1.442695, %v1730_v51  ;;  %v1732_v37 = vpop.xlane.xlu0 %1731 }
 0x2aa   : > { %v3771_v14 = vpop.eup %3770  ;;  %2579 = vst [vmem:[%s4851_s9 + $0x80] sm:$0xff] %v2515_v0  ;;  %v2011_v11 = vadd.f32 1.0, %v3769_v52  ;;  %3790 = vpow2.f32 %v2924_v17  ;;  %v2927_v15 = vmul.f32 -1.442695, %v1732_v37 }
 0x2ab   : > { %v3773_v9 = vpop.eup %3772  ;;  %v2516_v63 = vmul.f32 %v3771_v14, %v4535_v6  ;;  %3792 = vrcp.f32 %v2010_v7 }
 0x2ac   : > { %v3775_v8 = vpop.eup %3774  ;;  %3794 = vrcp.f32 %v2011_v11  ;;  %v2012_v49 = vadd.f32 1.0, %v3773_v9  ;;  %v1734_v58 = vpop.xlane.xlu1 %1733 }
 0x2ad   : > { %v3777_v25 = vpop.eup %3776  ;;  %2580 = vst [vmem:[%s4851_s9 + $0x88] sm:$0xff] %v2516_v63  ;;  %v2517_v20 = vmul.f32 %v3775_v8, %v4552_v19  ;;  %3796 = vpow2.f32 %v2925_v28  ;;  %v2928_v13 = vmul.f32 -1.442695, %v1734_v58  ;;  %v1736_v23 = vpop.xlane.xlu0 %1735 }
 0x2ae   : > { %v3779_v40 = vpop.eup %3778  ;;  %3798 = vrcp.f32 %v2012_v49  ;;  %v2013_v38 = vadd.f32 1.0, %v3777_v25  ;;  %v2929_v61 = vmul.f32 -1.442695, %v1736_v23 }
 0x2af   : > { %v3781_v35 = vpop.eup %3780  ;;  %2581 = vst [vmem:[%s4851_s9 + $0x90] sm:$0xff] %v2517_v20  ;;  %v2518_v6 = vmul.f32 %v3779_v40, %v4548_v16  ;;  %3800 = vpow2.f32 %v2926_v22 }
 0x2b0   : > { %v3783_v47 = vpop.eup %3782  ;;  %3802 = vrcp.f32 %v2013_v38  ;;  %v2014_v30 = vadd.f32 1.0, %v3781_v35  ;;  %v1738_v16 = vpop.xlane.xlu1 %1737 }
 0x2b1   : > { %v3785_v19 = vpop.eup %3784  ;;  %2582 = vst [vmem:[%s4851_s9 + $0x98] sm:$0xff] %v2518_v6  ;;  %v2519_v56 = vmul.f32 %v3783_v47, %v4565_v29  ;;  %3804 = vpow2.f32 %v2927_v15  ;;  %v2930_v1 = vmul.f32 -1.442695, %v1738_v16  ;;  %v1740_v17 = vpop.xlane.xlu0 %1739 }
 0x2b2   : > { %v3787_v21 = vpop.eup %3786  ;;  %v2520_v34 = vmul.f32 %v3785_v19, %v4561_v26  ;;  %3806 = vrcp.f32 %v2014_v30  ;;  %v2931_v29 = vmul.f32 -1.442695, %v1740_v17 }
 0x2b3   : > { %v3789_v44 = vpop.eup %3788  ;;  %2583 = vst [vmem:[%s4851_s9 + $0xa0] sm:$0xff] %v2519_v56  ;;  %v2521_v53 = vmul.f32 %v3787_v21, %v4578_v39  ;;  %3808 = vpow2.f32 %v2928_v13 }
 0x2b4   : > { %v3791_v42 = vpop.eup %3790  ;;  %2584 = vst [vmem:[%s4851_s9 + $0xa8] sm:$0xff] %v2520_v34  ;;  %v2015_v57 = vadd.f32 1.0, %v3789_v44  ;;  %3810 = vpow2.f32 %v2929_v61  ;;  %v1742_v28 = vpop.xlane.xlu1 %1741 }
 0x2b5   : > { %v3793_v0 = vpop.eup %3792  ;;  %2585 = vst [vmem:[%s4851_s9 + $0xb0] sm:$0xff] %v2521_v53  ;;  %v2016_v52 = vadd.f32 1.0, %v3791_v42  ;;  %3812 = vpow2.f32 %v2930_v1  ;;  %v2932_v11 = vmul.f32 -1.442695, %v1742_v28  ;;  %v1744_v51 = vpop.xlane.xlu0 %1743 }
 0x2b6   : > { %v3795_v26 = vpop.eup %3794  ;;  %v2522_v7 = vmul.f32 %v3793_v0, %v4574_v36  ;;  %3814 = vrcp.f32 %v2015_v57  ;;  %v2933_v22 = vmul.f32 -1.442695, %v1744_v51 }
 0x2b7   : > { %v3797_v39 = vpop.eup %3796  ;;  %v2523_v14 = vmul.f32 %v3795_v26, %v4591_v48  ;;  %3816 = vrcp.f32 %v2016_v52 }
 0x2b8   : > { %v3799_v9 = vpop.eup %3798  ;;  %2586 = vst [vmem:[%s4851_s9 + $0xb8] sm:$0xff] %v2522_v7  ;;  %v2017_v63 = vadd.f32 1.0, %v3797_v39  ;;  %3818 = vpow2.f32 %v2931_v29  ;;  %v1746_v25 = vpop.xlane.xlu1 %1745 }
 0x2b9   : > { %v3801_v37 = vpop.eup %3800  ;;  %2587 = vst [vmem:[%s4851_s9 + $0xc0] sm:$0xff] %v2523_v14  ;;  %v2524_v8 = vmul.f32 %v3799_v9, %v4587_v46  ;;  %3820 = vpow2.f32 %v2932_v11  ;;  %v2934_v15 = vmul.f32 -1.442695, %v1746_v25  ;;  %v1748_v40 = vpop.xlane.xlu0 %1747 }
 0x2ba   : > { %v3803_v36 = vpop.eup %3802  ;;  %3822 = vrcp.f32 %v2017_v63  ;;  %v2018_v49 = vadd.f32 1.0, %v3801_v37  ;;  %v2935_v35 = vmul.f32 -1.442695, %v1748_v40 }
 0x2bb   : > { %v3805_v48 = vpop.eup %3804  ;;  %2588 = vst [vmem:[%s4851_s9 + $0xc8] sm:$0xff] %v2524_v8  ;;  %v2525_v20 = vmul.f32 %v3803_v36, %v4604_v59  ;;  %3824 = vpow2.f32 %v2933_v22 }
 0x2bc   : > { %v3807_v38 = vpop.eup %3806  ;;  %3826 = vrcp.f32 %v2018_v49  ;;  %v2019_v58 = vadd.f32 1.0, %v3805_v48  ;;  %v1750_v47 = vpop.xlane.xlu1 %1749 }
 0x2bd   : > { %v3809_v6 = vpop.eup %3808  ;;  %2589 = vst [vmem:[%s4851_s9 + $0xd0] sm:$0xff] %v2525_v20  ;;  %v2526_v46 = vmul.f32 %v3807_v38, %v4600_v55  ;;  %3828 = vpow2.f32 %v2934_v15  ;;  %v2936_v61 = vmul.f32 -1.442695, %v1750_v47  ;;  %v1752_v19 = vpop.xlane.xlu0 %1751 }
 0x2be   : > { %v3811_v13 = vpop.eup %3810  ;;  %3830 = vrcp.f32 %v2019_v58  ;;  %v2020_v23 = vadd.f32 1.0, %v3809_v6  ;;  %v2937_v34 = vmul.f32 -1.442695, %v1752_v19 }
 0x2bf   : > { %v3813_v30 = vpop.eup %3812  ;;  %2590 = vst [vmem:[%s4851_s9 + $0xd8] sm:$0xff] %v2526_v46  ;;  %v2021_v59 = vadd.f32 1.0, %v3811_v13  ;;  %3832 = vpow2.f32 %v2935_v35 }
 0x2c0   : > { %v3815_v56 = vpop.eup %3814  ;;  %3834 = vrcp.f32 %v2020_v23  ;;  %v2022_v21 = vadd.f32 1.0, %v3813_v30  ;;  %v1754_v1 = vpop.xlane.xlu1 %1753 }
 0x2c1   : > { %v3817_v16 = vpop.eup %3816  ;;  %v2527_v55 = vmul.f32 %v3815_v56, %v4617_v4  ;;  %3836 = vrcp.f32 %v2021_v59  ;;  %v2938_v57 = vmul.f32 -1.442695, %v1754_v1  ;;  %v1756_v29 = vpop.xlane.xlu0 %1755 }
 0x2c2   : > { %v3819_v44 = vpop.eup %3818  ;;  %v2528_v53 = vmul.f32 %v3817_v16, %v4613_v2  ;;  %3838 = vrcp.f32 %v2022_v21  ;;  %v2939_v7 = vmul.f32 -1.442695, %v1756_v29 }
 0x2c3   : > { %v3821_v17 = vpop.eup %3820  ;;  %2591 = vst [vmem:[%s4851_s9 + $0xe0] sm:$0xff] %v2527_v55  ;;  %v2023_v42 = vadd.f32 1.0, %v3819_v44  ;;  %3840 = vpow2.f32 %v2936_v61 }
 0x2c4   : > { %v3823_v0 = vpop.eup %3822  ;;  %2592 = vst [vmem:[%s4851_s9 + $0xe8] sm:$0xff] %v2528_v53  ;;  %v2024_v52 = vadd.f32 1.0, %v3821_v17  ;;  %3842 = vpow2.f32 %v2937_v34  ;;  %v1758_v39 = vpop.xlane.xlu1 %1757 }
 0x2c5   : > { %v3825_v26 = vpop.eup %3824  ;;  %v2529_v4 = vmul.f32 %v3823_v0, %v4630_v18  ;;  %3844 = vrcp.f32 %v2023_v42  ;;  %v2940_v51 = vmul.f32 -1.442695, %v1758_v39  ;;  %v1760_v9 = vpop.xlane.xlu0 %1759 }
 0x2c6   : > { %v3827_v2 = vpop.eup %3826  ;;  %3846 = vrcp.f32 %v2024_v52  ;;  %v2025_v28 = vadd.f32 1.0, %v3825_v26  ;;  %v2941_v8 = vmul.f32 -1.442695, %v1760_v9 }
 0x2c7   : > { %v3829_v14 = vpop.eup %3828  ;;  %2593 = vst [vmem:[%s4851_s9 + $0xf0] sm:$0xff] %v2529_v4  ;;  %v2530_v11 = vmul.f32 %v3827_v2, %v4626_v12  ;;  %3848 = vpow2.f32 %v2938_v57 }
 0x2c8   : > { %v3831_v63 = vpop.eup %3830  ;;  %3850 = vrcp.f32 %v2025_v28  ;;  %v2026_v22 = vadd.f32 1.0, %v3829_v14  ;;  %v1762_v25 = vpop.xlane.xlu1 %1761 }
 0x2c9   : > { %v3833_v37 = vpop.eup %3832  ;;  %2594 = vst [vmem:[%s4851_s9 + $0xf8] sm:$0xff] %v2530_v11  ;;  %v2531_v18 = vmul.f32 %v3831_v63, %v4643_v32  ;;  %3852 = vpow2.f32 %v2939_v7  ;;  %v2942_v20 = vmul.f32 -1.442695, %v1762_v25  ;;  %v1764_v15 = vpop.xlane.xlu0 %1763 }
 0x2ca   : > { %v3835_v36 = vpop.eup %3834  ;;  %3854 = vrcp.f32 %v2026_v22  ;;  %v2027_v49 = vadd.f32 1.0, %v3833_v37  ;;  %v2943_v32 = vmul.f32 -1.442695, %v1764_v15 }
 0x2cb   : > { %v3837_v12 = vpop.eup %3836  ;;  %2595 = vst [vmem:[%s4851_s9 + $0x100] sm:$0xff] %v2531_v18  ;;  %v2532_v48 = vmul.f32 %v3835_v36, %v4639_v27  ;;  %3856 = vpow2.f32 %v2940_v51 }
 0x2cc   : > { %v3839_v40 = vpop.eup %3838  ;;  %v2533_v38 = vmul.f32 %v3837_v12, %v4656_v45  ;;  %3858 = vrcp.f32 %v2027_v49  ;;  %v1766_v27 = vpop.xlane.xlu1 %1765 }
 0x2cd   : > { %v3841_v58 = vpop.eup %3840  ;;  %2596 = vst [vmem:[%s4851_s9 + $0x108] sm:$0xff] %v2532_v48  ;;  %v2534_v35 = vmul.f32 %v3839_v40, %v4652_v41  ;;  %3860 = vpow2.f32 %v2941_v8  ;;  %v2944_v47 = vmul.f32 -1.442695, %v1766_v27  ;;  %v1768_v45 = vpop.xlane.xlu0 %1767 }
 0x2ce   : > { %v3843_v6 = vpop.eup %3842  ;;  %2597 = vst [vmem:[%s4851_s9 + $0x110] sm:$0xff] %v2533_v38  ;;  %v2028_v46 = vadd.f32 1.0, %v3841_v58  ;;  %3862 = vpow2.f32 %v2942_v20  ;;  %v2945_v61 = vmul.f32 -1.442695, %v1768_v45 }
 0x2cf   : > { %v3845_v13 = vpop.eup %3844  ;;  %2598 = vst [vmem:[%s4851_s9 + $0x118] sm:$0xff] %v2534_v35  ;;  %v2029_v23 = vadd.f32 1.0, %v3843_v6  ;;  %3864 = vpow2.f32 %v2943_v32 }
 0x2d0   : > { %v3847_v30 = vpop.eup %3846  ;;  %v2535_v59 = vmul.f32 %v3845_v13, %v4669_v60  ;;  %3866 = vrcp.f32 %v2028_v46  ;;  %v1770_v34 = vpop.xlane.xlu1 %1769 }
 0x2d1   : > { %v3849_v41 = vpop.eup %3848  ;;  %v2536_v19 = vmul.f32 %v3847_v30, %v4665_v54  ;;  %3868 = vrcp.f32 %v2029_v23  ;;  %v2946_v44 = vmul.f32 -1.442695, %v1770_v34  ;;  %v1772_v60 = vpop.xlane.xlu0 %1771  ;;  %v5108_v34 = vld [vmem:[#allocation10_spill] sm:$0xff] }
 0x2d2   : > { %v3851_v56 = vpop.eup %3850  ;;  %2599 = vst [vmem:[%s4851_s9 + $0x120] sm:$0xff] %v2535_v59  ;;  %v2030_v21 = vadd.f32 1.0, %v3849_v41  ;;  %3870 = vpow2.f32 %v2944_v47  ;;  %v2947_v17 = vmul.f32 -1.442695, %v1772_v60 }
 0x2d3   : > { %v3853_v16 = vpop.eup %3852  ;;  %2600 = vst [vmem:[%s4851_s9 + $0x128] sm:$0xff] %v2536_v19  ;;  %v2537_v55 = vmul.f32 %v3851_v56, %v4682_v10  ;;  %3872 = vpow2.f32 %v2945_v61  ;;  %v5107_v19 = vld [vmem:[#allocation8_spill] sm:$0xff] }
 0x2d4   : > { %v3855_v53 = vpop.eup %3854  ;;  %3874 = vrcp.f32 %v2030_v21  ;;  %v2031_v1 = vadd.f32 1.0, %v3853_v16  ;;  %v1774_v0 = vpop.xlane.xlu1 %1773 }
 0x2d5   : > { %v3857_v54 = vpop.eup %3856  ;;  %2601 = vst [vmem:[%s4851_s9 + $0x130] sm:$0xff] %v2537_v55  ;;  %v2538_v42 = vmul.f32 %v3855_v53, %v4678_v5  ;;  %3876 = vpow2.f32 %v2946_v44  ;;  %v2948_v26 = vmul.f32 -1.442695, %v1774_v0  ;;  %v1776_v4 = vpop.xlane.xlu0 %1775 }
 0x2d6   : > { %v3859_v57 = vpop.eup %3858  ;;  %3878 = vrcp.f32 %v2031_v1  ;;  %v2032_v29 = vadd.f32 1.0, %v3857_v54  ;;  %v2949_v5 = vmul.f32 -1.442695, %v1776_v4 }
 0x2d7   : > { %v3861_v52 = vpop.eup %3860  ;;  %2602 = vst [vmem:[%s4851_s9 + $0x138] sm:$0xff] %v2538_v42  ;;  %v2539_v10 = vmul.f32 %v3859_v57, %v4695_v31  ;;  %3880 = vpow2.f32 %v2947_v17  ;;  %v5109_v42 = vld [vmem:[#allocation9_spill] sm:$0xff] }
 0x2d8   : > { %v3863_v7 = vpop.eup %3862  ;;  %3882 = vrcp.f32 %v2032_v29  ;;  %v2033_v2 = vadd.f32 1.0, %v3861_v52  ;;  %v1778_v51 = vpop.xlane.xlu1 %1777  ;;  %v5110_v52 = vld [vmem:[#allocation12_spill] sm:$0xff] }
 0x2d9   : > { %v3865_v28 = vpop.eup %3864  ;;  %2603 = vst [vmem:[%s4851_s9 + $0x140] sm:$0xff] %v2539_v10  ;;  %v2034_v39 = vadd.f32 1.0, %v3863_v7  ;;  %3884 = vpow2.f32 %v2948_v26  ;;  %v2950_v63 = vmul.f32 -1.442695, %v1778_v51  ;;  %v1780_v22 = vpop.xlane.xlu0 %1779  ;;  %v5112_v51 = vld [vmem:[#allocation14_spill] sm:$0xff] }
 0x2da   : > { %v3867_v14 = vpop.eup %3866  ;;  %3886 = vrcp.f32 %v2033_v2  ;;  %v2035_v11 = vadd.f32 1.0, %v3865_v28  ;;  %v2951_v49 = vmul.f32 -1.442695, %v1780_v22  ;;  %v5111_v28 = vld [vmem:[#allocation11_spill] sm:$0xff] }
 0x2db   : > { %v3869_v9 = vpop.eup %3868  ;;  %v2540_v31 = vmul.f32 %v3867_v14, %v4691_v24  ;;  %3888 = vrcp.f32 %v2034_v39 }
 0x2dc   : > { %v3871_v37 = vpop.eup %3870  ;;  %v2541_v18 = vmul.f32 %v3869_v9, %v4708_v50  ;;  %3890 = vrcp.f32 %v2035_v11  ;;  %v1782_v48 = vpop.xlane.xlu1 %1781 }
 0x2dd   : > { %v3873_v8 = vpop.eup %3872  ;;  %2604 = vst [vmem:[%s4851_s9 + $0x148] sm:$0xff] %v2540_v31  ;;  %v2036_v36 = vadd.f32 1.0, %v3871_v37  ;;  %3892 = vpow2.f32 %v2949_v5  ;;  %v2952_v15 = vmul.f32 -1.442695, %v1782_v48  ;;  %v1784_v40 = vpop.xlane.xlu0 %1783  ;;  %v5113_v37 = vld [vmem:[#allocation13_spill] sm:$0xff] }
 0x2de   : > { %v3875_v25 = vpop.eup %3874  ;;  %2605 = vst [vmem:[%s4851_s9 + $0x150] sm:$0xff] %v2541_v18  ;;  %v2037_v12 = vadd.f32 1.0, %v3873_v8  ;;  %3894 = vpow2.f32 %v2950_v63  ;;  %v2953_v35 = vmul.f32 -1.442695, %v1784_v40 }
 0x2df   : > { %v3877_v20 = vpop.eup %3876  ;;  %v2542_v24 = vmul.f32 %v3875_v25, %v4704_v43  ;;  %3896 = vrcp.f32 %v2036_v36 }
 0x2e0   : > { %v3879_v50 = vpop.eup %3878  ;;  %3898 = vrcp.f32 %v2037_v12  ;;  %v2038_v38 = vadd.f32 1.0, %v3877_v20  ;;  %v1786_v27 = vpop.xlane.xlu1 %1785 }
 0x2e1   : > { %v3881_v32 = vpop.eup %3880  ;;  %2606 = vst [vmem:[%s4851_s9 + $0x158] sm:$0xff] %v2542_v24  ;;  %v2543_v58 = vmul.f32 %v3879_v50, %v4721_v3  ;;  %3900 = vpow2.f32 %v2951_v49  ;;  %v2954_v23 = vmul.f32 -1.442695, %v1786_v27  ;;  %v1788_v47 = vpop.xlane.xlu0 %1787  ;;  %v5114_v24 = vld [vmem:[#allocation16_spill] sm:$0xff]  ;;  %v5115_v50 = vld [vmem:[#allocation15_spill] sm:$0xff] }
 0x2e2   : > { %v3883_v6 = vpop.eup %3882  ;;  %3902 = vrcp.f32 %v2038_v38  ;;  %v2039_v46 = vadd.f32 1.0, %v3881_v32  ;;  %v2955_v59 = vmul.f32 -1.442695, %v1788_v47 }
 0x2e3   : > { %v3885_v13 = vpop.eup %3884  ;;  %2607 = vst [vmem:[%s4851_s9 + $0x160] sm:$0xff] %v2543_v58  ;;  %v2544_v43 = vmul.f32 %v3883_v6, %v4717_v62  ;;  %3904 = vpow2.f32 %v2952_v15 }
 0x2e4   : > { %v3887_v45 = vpop.eup %3886  ;;  %3906 = vrcp.f32 %v2039_v46  ;;  %v2040_v30 = vadd.f32 1.0, %v3885_v13  ;;  %v1790_v62 = vpop.xlane.xlu1 %1789  ;;  %v5116_v46 = vld [vmem:[#allocation18_spill] sm:$0xff] }
 0x2e5   : > { %v3889_v3 = vpop.eup %3888  ;;  %2608 = vst [vmem:[%s4851_s9 + $0x168] sm:$0xff] %v2544_v43  ;;  %v2545_v61 = vmul.f32 %v3887_v45, %v4734_v33  ;;  %3908 = vpow2.f32 %v2953_v35  ;;  %v2956_v55 = vmul.f32 -1.442695, %v1790_v62  ;;  %v1792_v44 = vpop.xlane.xlu0 %1791  ;;  %v5117_v43 = vld [vmem:[#allocation17_spill] sm:$0xff]  ;;  %v5118_v45 = vld [vmem:[#allocation20_spill] sm:$0xff] }
 0x2e6   : > { %v3891_v41 = vpop.eup %3890  ;;  %v2546_v56 = vmul.f32 %v3889_v3, %v5107_v19  ;;  %3910 = vrcp.f32 %v2040_v30  ;;  %v2957_v33 = vmul.f32 -1.442695, %v1792_v44  ;;  %v5122_v44 = vld [vmem:[#allocation24_spill] sm:$0xff] }
 0x2e7   : > { %v3893_v21 = vpop.eup %3892  ;;  %2609 = vst [vmem:[%s4851_s9 + $0x170] sm:$0xff] %v2545_v61  ;;  %v2547_v16 = vmul.f32 %v3891_v41, %v5108_v34  ;;  %3912 = vpow2.f32 %v2954_v23  ;;  %v5119_v61 = vld [vmem:[#allocation19_spill] sm:$0xff] }
 0x2e8   : > { %v3895_v60 = vpop.eup %3894  ;;  %2610 = vst [vmem:[%s4851_s9 + $0x178] sm:$0xff] %v2546_v56  ;;  %v2041_v53 = vadd.f32 1.0, %v3893_v21  ;;  %3914 = vpow2.f32 %v2955_v59  ;;  %v1794_v29 = vpop.xlane.xlu1 %1793  ;;  %v5120_v56 = vld [vmem:[#allocation22_spill] sm:$0xff]  ;;  %v5121_v21 = vld [vmem:[#allocation21_spill] sm:$0xff] }
 0x2e9   : > { %v3897_v1 = vpop.eup %3896  ;;  %2611 = vst [vmem:[%s4851_s9 + $0x180] sm:$0xff] %v2547_v16  ;;  %v2042_v17 = vadd.f32 1.0, %v3895_v60  ;;  %3916 = vpow2.f32 %v2956_v55  ;;  %v2958_v26 = vmul.f32 -1.442695, %v1794_v29 }
 0x2ea   : > { %v3899_v54 = vpop.eup %3898  ;;  %v2548_v57 = vmul.f32 %v3897_v1, %v5109_v42  ;;  %3918 = vrcp.f32 %v2041_v53  ;;  %v5123_v53 = vld [vmem:[#allocation23_spill] sm:$0xff] }
 0x2eb   : > { %v3901_v0 = vpop.eup %3900  ;;  %v2549_v10 = vmul.f32 %v3899_v54, %v5110_v52  ;;  %3920 = vrcp.f32 %v2042_v17 }
 0x2ec   : > { %v3903_v4 = vpop.eup %3902  ;;  %2612 = vst [vmem:[%s4851_s9 + $0x188] sm:$0xff] %v2548_v57  ;;  %v2043_v7 = vadd.f32 1.0, %v3901_v0  ;;  %3922 = vpow2.f32 %v2957_v33 }
 0x2ed   : > { %v3905_v2 = vpop.eup %3904  ;;  %2613 = vst [vmem:[%s4851_s9 + $0x190] sm:$0xff] %v2549_v10  ;;  %v2550_v39 = vmul.f32 %v3903_v4, %v5111_v28  ;;  %3924 = vpow2.f32 %v2958_v26 }
 0x2ee   : > { %v3907_v5 = vpop.eup %3906  ;;  %3926 = vrcp.f32 %v2043_v7  ;;  %v2044_v14 = vadd.f32 1.0, %v3905_v2 }
 0x2ef   : > { %v3909_v11 = vpop.eup %3908  ;;  %2614 = vst [vmem:[%s4851_s9 + $0x198] sm:$0xff] %v2550_v39  ;;  %v2551_v9 = vmul.f32 %v3907_v5, %v5112_v51 }
 0x2f0   : > { %v3911_v31 = vpop.eup %3910  ;;  %3928 = vrcp.f32 %v2044_v14  ;;  %v2045_v63 = vadd.f32 1.0, %v3909_v11 }
 0x2f1   : > { %v3913_v22 = vpop.eup %3912  ;;  %2615 = vst [vmem:[%s4851_s9 + $0x1a0] sm:$0xff] %v2551_v9  ;;  %v2552_v18 = vmul.f32 %v3911_v31, %v5113_v37 }
 0x2f2   : > { %v3915_v8 = vpop.eup %3914  ;;  %3930 = vrcp.f32 %v2045_v63  ;;  %v2046_v36 = vadd.f32 1.0, %v3913_v22 }
 0x2f3   : > { %v3917_v49 = vpop.eup %3916  ;;  %2616 = vst [vmem:[%s4851_s9 + $0x1a8] sm:$0xff] %v2552_v18  ;;  %v2047_v25 = vadd.f32 1.0, %v3915_v8 }
 0x2f4   : > { %v3919_v12 = vpop.eup %3918  ;;  %3932 = vrcp.f32 %v2046_v36  ;;  %v2048_v48 = vadd.f32 1.0, %v3917_v49 }
 0x2f5   : > { %v3921_v20 = vpop.eup %3920  ;;  %v2553_v15 = vmul.f32 %v3919_v12, %v5114_v24  ;;  %3934 = vrcp.f32 %v2047_v25 }
 0x2f6   : > { %v3923_v40 = vpop.eup %3922  ;;  %v2554_v38 = vmul.f32 %v3921_v20, %v5115_v50  ;;  %3936 = vrcp.f32 %v2048_v48 }
 0x2f7   : > { %v3925_v32 = vpop.eup %3924  ;;  %2617 = vst [vmem:[%s4851_s9 + $0x1b0] sm:$0xff] %v2553_v15  ;;  %v2049_v58 = vadd.f32 1.0, %v3923_v40 }
 0x2f8   : > { %v3927_v35 = vpop.eup %3926  ;;  %2618 = vst [vmem:[%s4851_s9 + $0x1b8] sm:$0xff] %v2554_v38  ;;  %v2050_v6 = vadd.f32 1.0, %v3925_v32 }
 0x2f9   : > { %v2555_v27 = vmul.f32 %v3927_v35, %v5116_v46  ;;  %3938 = vrcp.f32 %v2049_v58 }
 0x2fa   : > { %v3929_v13 = vpop.eup %3928  ;;  %3940 = vrcp.f32 %v2050_v6 }
 0x2fb   : > { %2619 = vst [vmem:[%s4851_s9 + $0x1c0] sm:$0xff] %v2555_v27  ;;  %v2556_v23 = vmul.f32 %v3929_v13, %v5117_v43 }
 0x2fc   : > { %v3931_v47 = vpop.eup %3930 }
 0x2fd   : > { %2620 = vst [vmem:[%s4851_s9 + $0x1c8] sm:$0xff] %v2556_v23  ;;  %v2557_v30 = vmul.f32 %v3931_v47, %v5118_v45 }
 0x2fe   : > { %v3933_v59 = vpop.eup %3932 }
 0x2ff   : > { %v3935_v3 = vpop.eup %3934  ;;  %2621 = vst [vmem:[%s4851_s9 + $0x1d0] sm:$0xff] %v2557_v30  ;;  %v2558_v41 = vmul.f32 %v3933_v59, %v5119_v61 }
 0x300   : > { %v3937_v19 = vpop.eup %3936  ;;  %v2559_v62 = vmul.f32 %v3935_v3, %v5120_v56 }
 0x301   : > { %2622 = vst [vmem:[%s4851_s9 + $0x1d8] sm:$0xff] %v2558_v41  ;;  %v2560_v34 = vmul.f32 %v3937_v19, %v5121_v21 }
 0x302   : > { %2623 = vst [vmem:[%s4851_s9 + $0x1e0] sm:$0xff] %v2559_v62 }
 0x303   : > { %v3939_v16 = vpop.eup %3938  ;;  %2624 = vst [vmem:[%s4851_s9 + $0x1e8] sm:$0xff] %v2560_v34 }
 0x304   : > { %v3941_v55 = vpop.eup %3940  ;;  %v2561_v60 = vmul.f32 %v3939_v16, %v5122_v44 }
 0x305   : > { %v2562_v33 = vmul.f32 %v3941_v55, %v5123_v53 }
 0x306   : > { %2625 = vst [vmem:[%s4851_s9 + $0x1f0] sm:$0xff] %v2561_v60 }
 0x307   : > { %2626 = vst [vmem:[%s4851_s9 + $0x1f8] sm:$0xff] %v2562_v33 }
 0x308   : > { %3983 = shalt.err (!%p3980_p9)
}
 0x309   : > { %s3984_s9 = scalar_lea.hbm %s5015_s29, 8192  ;;  %s3988_s22 = scalar_lea.hbm %s5070_s7, 16384 }
 0x30a   : > { %p3985_p10 = scmp.ne.s32.totalorder %s5015_s29, %s3984_s9  ;;  %p3989_p13 = scmp.lt.u32.totalorder %s5015_s29, %s5070_s7 }
 0x30b   : > { %p3990_p0 = scmp.lt.u32.totalorder %s3988_s22, %s3984_s9  ;;  %p3992_p2 = scmp.lt.u32.totalorder %s3984_s9, %s5015_s29 }
 0x30c   : > { %p3986_p11 = pnand %p3985_p10, %p4122_p5 }
 0x30d   : > { %p3991_p1 = por %p3990_p0, %p3989_p13 }
 0x30e   : > { %p3987_p12 = pneg %p3986_p11 }
 0x30f   : > { %p3993_p3 = por %p3992_p2, %p3991_p1 }
 0x311   : > { %p3994_p4 = pnand %p3993_p3, %p3987_p12 }
 0x313   : > { %3997 = shalt.err (!%p3994_p4)
}
 0x314   : > { %s4042_s23 = smov 128   ;;  %s4043_s8 = smov 8  }
 0x315   : > { %3639 = dma.vmem_to_hbm [thread:$0]  (%p4122_p5), %s5017_s17, 8192, %s5015_s29, %s2633_s28, %s4042_s23, %s4042_s23, %s4043_s8  }
 0x316 PF: > { %p3649_p7 = scmp.ge.s32.totalorder %s4036_s27, 2  ;;  %s2677_s13 = sand.u32 1, %s4024_s24  }
 0x317   : > { %s2678_s15 = scalar_lea.sflag [#allocation3], %s2677_s13 }
 0x318   : > { %p3643_p8 = pnand %p3649_p7, %p4126_p6 }
 0x31a   : > { %4015 = dma.done.wait (!%p3643_p8), %s2678_s15, 4096  }
 0x31b   : > { %4017 = vsyncadd (!%p3643_p8), %s2678_s15, 4294963200  ;;  %s2687_s16 = scalar_lea.sflag [#allocation5], %s2677_s13 }
 0x31c   : > { %4019 = dma.done.wait (!%p3643_p8), %s2687_s16, 8192  }
 0x31d   : > { %4021 = vsyncadd (!%p3643_p8), %s2687_s16, 4294959104  ;;  %p21_p5 = scmp.ge.s32.totalorder %s4109_s30, 4   ;;  %s5124_s24 = smov %s4028_s25 }
 0x31e   : > { %s5125_s25 = smov %s4032_s26  ;;  %s5126_s26 = smov %s4120_s10 }
 0x31f   : > { %s5127_s27 = smov %s4109_s30  ;;  %23 = sbr.rel (!%p21_p5) target bundleno = 5 (0x5), region = 96 }
 0x326   :  { %2692 = vsyncpa [#allocation3], 1 }
 0x327   :  { %2694 = vsyncpa [#allocation3 + $0x1], 1 }
 0x328   :  { %2695 = vsyncpa [#allocation5], 1 }
 0x329   :  { %2697 = vsyncpa [#allocation5 + $0x1], 1 }

</bundles_post_ra>
